<compile_context>
chip_gen: v5e
topology: v5e:2x2
jax: 0.10.0
libtpu: 0.0.40
codegen_flags: <defaults>
</compile_context>

<pallas_src>
import functools

import jax
import jax.numpy as jnp
from jax import lax
from jax.experimental import pallas as pl
from jax.experimental.pallas import tpu as pltpu


# ----------------------------------------------------------------------------
# Kernel
# ----------------------------------------------------------------------------
def _osg_decoder_kernel(x_ref, w1_ref, b1_ref, w2_ref, b2_ref, out_ref,
                        *, out_dim, act_dtype):
    """One packed row-tile of the decoder MLP (transposed orientation).

    x_ref  : (tg, P*C)      P points packed per 128-lane row (matmul dtype)
    w1_ref : (P*H, P*C)     block-diagonal W1^T              (matmul dtype)
    b1_ref : (P*H, 1)       tiled b1 (f32)
    w2_ref : (P*OUT, P*H)   block-diagonal W2^T              (matmul dtype)
    b2_ref : (P*OUT, 1)     tiled b2 (f32)
    out_ref: (P*OUT, tg)    row p*OUT+0 = raw sigma of point p of the group,
                            rows p*OUT+1.. = sigmoid(y)*1.002 - 0.001
    """
    # FC1 (transposed): contract the packed feature axis (128-deep on the MXU).
    h = lax.dot_general(
        w1_ref[...], x_ref[...],
        dimension_numbers=(((1,), (1,)), ((), ())),
        preferred_element_type=jnp.float32,
    ) + b1_ref[...]

    # Softplus on a lane-dense (P*H, tg) tile. act_dtype is bf16 on v6e/v7x
    # (2x EUP rate), f32 on v5e/older (no bf16 EUP there).
    h = jax.nn.softplus(h.astype(act_dtype))

    # Fused FC2 (sigma + rgb in one matmul), same MXU dtype as FC1,
    # f32 accumulation.
    h = h.astype(w2_ref.dtype)
    y = jnp.dot(w2_ref[...], h, preferred_element_type=jnp.float32) + b2_ref[...]

    # Per-point channel index: channel 0 -> raw sigma, 1.. -> squashed rgb.
    chan = lax.broadcasted_iota(jnp.int32, y.shape, 0) % out_dim
    rgb = (jax.nn.sigmoid(y.astype(act_dtype)).astype(jnp.float32)
           * (1.0 + 2.0 * 0.001) - 0.001)
    out_ref[...] = jnp.where(chan == 0, y, rgb).astype(out_ref.dtype)


# ----------------------------------------------------------------------------
# Wrapper
# ----------------------------------------------------------------------------
def _default_act_dtype():
    """bf16 activations on v6e/v7x (bf16 VPU/EUP); f32 on older generations."""
    try:
        kind = jax.devices()[0].device_kind.lower()
    except Exception:
        return jnp.float32
    for old in ("v2", "v3", "v4", "v5"):
        if old in kind:
            return jnp.float32
    return jnp.bfloat16


def osg_decoder_forward(point_features, params, *, tm=16384,
                        matmul_dtype=jnp.bfloat16, act_dtype=None):
    """Pallas equivalent of OSGDecoder.forward (additional_layer_num=0).

    point_features: (N, R, K, C) float32
    params: dict with w1 (C,H), b1 (H,), w2 (H, 1+D), b2 (1+D,)
            (lr_multiplier already folded into the effective weights)
    tm:            row-tile size in *points* (rounded to the packing/lane grain)
    matmul_dtype:  dtype of both operands of both MXU matmuls (f32 accumulation)
    act_dtype:     dtype of softplus/sigmoid; None -> auto (bf16 on v6e/v7x,
                   f32 on v5e and older)
    Returns {'rgb': (N, R*K, D), 'sigma': (N, R*K, 1)}
    """
    if act_dtype is None:
        act_dtype = _default_act_dtype()

    N, R, K, C = point_features.shape
    M = N * R * K

    w1 = params["w1"]                                # (C, H)
    b1 = params["b1"]                                # (H,)
    w2 = params["w2"]                                # (H, 1+D)
    b2 = params["b2"]                                # (1+D,)
    H = w1.shape[1]
    OUT = w2.shape[1]                                # 1 + D
    D = OUT - 1

    # Lane packing factor: P points share one 128-lane row when C divides 128.
    P = 128 // C if (C < 128 and 128 % C == 0) else 1
    PC = P * C

    # Tile size in packed rows (groups of P points), multiple of 128 lanes.
    G = pl.cdiv(M, P)                                # packed rows needed
    tg = max(128, (int(tm) // P // 128) * 128)
    # Keep the grid length >= 2 on large inputs so both v7x TensorCores work.
    half = max(128, pl.cdiv(pl.cdiv(G, 2), 128) * 128)
    tg = min(tg, half)
    g_pad = pl.cdiv(G, tg) * tg
    grid = (g_pad // tg,)

    # Pack the input: (M, C) -> (g_pad, P*C). Padded rows are computed but
    # sliced off in the epilogue.
    x = point_features.reshape(M, C).astype(matmul_dtype)
    pad_rows = g_pad * P - M
    if pad_rows:
        x = jnp.pad(x, ((0, pad_rows), (0, 0)))
    xp = x.reshape(g_pad, PC)

    # Block-diagonal weights / tiled biases (tiny, one-time glue).
    eye_p = jnp.eye(P, dtype=jnp.float32)
    w1bd = jnp.kron(eye_p, w1.T.astype(jnp.float32)).astype(matmul_dtype)   # (P*H, P*C)
    b1bd = jnp.tile(b1.astype(jnp.float32), P).reshape(P * H, 1)            # (P*H, 1)
    w2bd = jnp.kron(eye_p, w2.T.astype(jnp.float32)).astype(matmul_dtype)   # (P*OUT, P*H)
    b2bd = jnp.tile(b2.astype(jnp.float32), P).reshape(P * OUT, 1)          # (P*OUT, 1)

    const = lambda i: (0, 0)                         # grid-invariant operands

    out_t = pl.pallas_call(
        functools.partial(_osg_decoder_kernel, out_dim=OUT, act_dtype=act_dtype),
        out_shape=jax.ShapeDtypeStruct((P * OUT, g_pad), jnp.float32),
        grid_spec=pltpu.PrefetchScalarGridSpec(
            num_scalar_prefetch=0,
            grid=grid,
            in_specs=[
                pl.BlockSpec((tg, PC), lambda i: (i, 0)),      # packed x tile
                pl.BlockSpec((P * H, PC), const),              # W1 block-diag
                pl.BlockSpec((P * H, 1), const),               # b1 tiled
                pl.BlockSpec((P * OUT, P * H), const),         # W2 block-diag
                pl.BlockSpec((P * OUT, 1), const),             # b2 tiled
            ],
            out_specs=pl.BlockSpec((P * OUT, tg), lambda i: (0, i)),
        ),
        compiler_params=pltpu.CompilerParams(
            dimension_semantics=("parallel",),       # megacore sharding on v7x
            vmem_limit_bytes=48 * 1024 * 1024,       # room for big tiles, < v7x 64 MiB
        ),
    )(xp, w1bd, b1bd, w2bd, b2bd)

    # Un-interleave the tiny (P*OUT, g_pad) output back to the module's
    # (N, R*K, {1,D}) convention (layout plumbing only).
    # TODO(synk): callers that can consume the packed (P*OUT, G) layout directly
    # would skip this transpose and its extra HBM round trip.
    y = (out_t.reshape(P, OUT, g_pad)
              .transpose(2, 0, 1)
              .reshape(g_pad * P, OUT))[:M]
    sigma = y[:, 0:1].reshape(N, R * K, 1)
    rgb = y[:, 1:].reshape(N, R * K, D)
    return {"rgb": rgb, "sigma": sigma}


# ----------------------------------------------------------------------------
# Deterministic synthetic parameters (mimics EG3D FullyConnectedLayer init,
# with lr_multiplier folded into the effective weights).
# ----------------------------------------------------------------------------
def make_params(key, n_features, hidden_dim, decoder_output_dim):
    k1, k2 = jax.random.split(key, 2)
    # effective weight scale = 1/sqrt(fan_in) (lr_mul cancels), bias init 0
    w1 = jax.random.normal(k1, (n_features, hidden_dim), jnp.float32) / jnp.sqrt(
        jnp.float32(n_features))
    b1 = jnp.zeros((hidden_dim,), jnp.float32)
    w2 = jax.random.normal(k2, (hidden_dim, 1 + decoder_output_dim),
                           jnp.float32) / jnp.sqrt(jnp.float32(hidden_dim))
    b2 = jnp.zeros((1 + decoder_output_dim,), jnp.float32)
    # TODO(synk): additional_layer_num > 0 would add more (hidden,hidden)
    # FC+Softplus pairs; the module default (0) is what is implemented here.
    return {"w1": w1, "b1": b1, "w2": w2, "b2": b2}


def reference_forward(point_features, params):
    """Pure-JAX reference matching the PyTorch module semantics."""
    N, R, K, C = point_features.shape
    x = point_features.reshape(-1, C)
    x = jax.nn.softplus(x @ params["w1"] + params["b1"])
    x = x @ params["w2"] + params["b2"]
    x = x.reshape(N, -1, x.shape[-1])
    rgb = jax.nn.sigmoid(x[..., 1:]) * (1 + 2 * 0.001) - 0.001
    sigma = x[..., 0:1]
    return {"rgb": rgb, "sigma": sigma}


# ----------------------------------------------------------------------------
if __name__ == "__main__":
    key = jax.random.PRNGKey(0)
    k_feat, k_par = jax.random.split(key)

    # Small shapes consistent with the module: (N, R, K, C)
    N, R, K, C = 2, 8, 16, 32          # M = N*R*K = 256 points
    hidden_dim = 64
    decoder_output_dim = 3             # rgb channels

    point_features = jax.random.normal(k_feat, (N, R, K, C), jnp.float32)
    params = make_params(k_par, C, hidden_dim, decoder_output_dim)
    ref = reference_forward(point_features, params)

    # Exact path: f32 operands on the MXU, f32 activations, tight tolerance.
    out = osg_decoder_forward(point_features, params,
                              matmul_dtype=jnp.float32,
                              act_dtype=jnp.float32)
    jax.block_until_ready(out)
    assert out["rgb"].shape == (N, R * K, decoder_output_dim)
    assert out["sigma"].shape == (N, R * K, 1)
    assert jnp.allclose(out["rgb"], ref["rgb"], atol=1e-5, rtol=1e-5)
    assert jnp.allclose(out["sigma"], ref["sigma"], atol=1e-5, rtol=1e-5)

    # Fast path: bf16 MXU operands, auto activation dtype (bf16 on v6e/v7x,
    # f32 on v5e), f32 accumulation. Looser tolerance for bf16 quantization.
    out_fast = osg_decoder_forward(point_features, params,
                                   matmul_dtype=jnp.bfloat16)
    jax.block_until_ready(out_fast)
    assert jnp.allclose(out_fast["rgb"], ref["rgb"], atol=1e-1, rtol=1e-1)
    assert jnp.allclose(out_fast["sigma"], ref["sigma"], atol=1e-1, rtol=1e-1)

    print("KERNEL_OK")
</pallas_src>

<mosaic_0001>
module attributes {stable_mosaic.version = 11 : i64} {
  func.func @_osg_decoder_kernel(%arg0: i32, %arg1: memref<128x128xf32, #tpu.memory_space<vmem>>, %arg2: memref<256x128xf32, #tpu.memory_space<vmem>>, %arg3: memref<256x1xf32, #tpu.memory_space<vmem>>, %arg4: memref<16x256xf32, #tpu.memory_space<vmem>>, %arg5: memref<16x1xf32, #tpu.memory_space<vmem>>, %arg6: memref<16x128xf32, #tpu.memory_space<vmem>>) attributes {dimension_semantics = [#tpu.dimension_semantics<parallel>], iteration_bounds = array<i64: 1>, scalar_prefetch = 0 : i64, scratch_operands = 0 : i64, tpu.core_type = #tpu.core_type<tc>, window_params = [{transform_indices = @transform_0, window_bounds = array<i64: 128, 128>}, {pipeline_mode = #tpu.pipeline_mode<synchronous>, transform_indices = @transform_1, window_bounds = array<i64: 256, 128>}, {pipeline_mode = #tpu.pipeline_mode<synchronous>, transform_indices = @transform_2, window_bounds = array<i64: 256, 1>}, {pipeline_mode = #tpu.pipeline_mode<synchronous>, transform_indices = @transform_3, window_bounds = array<i64: 16, 256>}, {pipeline_mode = #tpu.pipeline_mode<synchronous>, transform_indices = @transform_4, window_bounds = array<i64: 16, 1>}, {transform_indices = @transform_5, window_bounds = array<i64: 16, 128>}]} {
    %c0 = arith.constant 0 : index
    %c0_0 = arith.constant 0 : index
    %0 = vector.load %arg2[%c0, %c0_0] : memref<256x128xf32, #tpu.memory_space<vmem>>, vector<256x128xf32>
    %c0_1 = arith.constant 0 : index
    %c0_2 = arith.constant 0 : index
    %1 = vector.load %arg1[%c0_1, %c0_2] : memref<128x128xf32, #tpu.memory_space<vmem>>, vector<128x128xf32>
    %cst = arith.constant dense<0.000000e+00> : vector<256x128xf32>
    %2 = tpu.matmul %0, %1, %cst {dimension_numbers = #tpu.dot_dimension_numbers<[1], [1], [0], [0], [0, 0, 1, 0], [], []>} : vector<256x128xf32>, vector<128x128xf32>, vector<256x128xf32> -> vector<256x128xf32>
    %c0_3 = arith.constant 0 : index
    %c0_4 = arith.constant 0 : index
    %3 = vector.load %arg3[%c0_3, %c0_4] : memref<256x1xf32, #tpu.memory_space<vmem>>, vector<256x1xf32>
    %4 = vector.broadcast %3 : vector<256x1xf32> to vector<256x128xf32>
    %5 = arith.addf %2, %4 : vector<256x128xf32>
    %cst_5 = arith.constant 0.000000e+00 : f32
    %6 = vector.broadcast %cst_5 : f32 to vector<256x128xf32>
    %7 = arith.maximumf %5, %6 : vector<256x128xf32>
    %8 = vector.broadcast %cst_5 : f32 to vector<256x128xf32>
    %9 = arith.subf %5, %8 : vector<256x128xf32>
    %10 = arith.cmpf one, %9, %9 : vector<256x128xf32>
    %11 = vector.broadcast %cst_5 : f32 to vector<256x128xf32>
    %12 = arith.addf %5, %11 : vector<256x128xf32>
    %13 = math.absf %9 : vector<256x128xf32>
    %cst_6 = arith.constant 0.000000e+00 : f32
    %14 = vector.broadcast %cst_6 : f32 to vector<256x128xf32>
    %15 = arith.subf %14, %13 : vector<256x128xf32>
    %16 = math.exp %15 : vector<256x128xf32>
    %17 = math.log1p %16 : vector<256x128xf32>
    %18 = arith.addf %7, %17 : vector<256x128xf32>
    %19 = arith.select %10, %12, %18 : vector<256x128xi1>, vector<256x128xf32>
    %c0_7 = arith.constant 0 : index
    %c0_8 = arith.constant 0 : index
    %20 = vector.load %arg4[%c0_7, %c0_8] : memref<16x256xf32, #tpu.memory_space<vmem>>, vector<16x256xf32>
    %cst_9 = arith.constant dense<0.000000e+00> : vector<16x128xf32>
    %21 = tpu.matmul %20, %19, %cst_9 {dimension_numbers = #tpu.dot_dimension_numbers<[1], [0], [0], [1], [0, 0, 1, 1], [], []>} : vector<16x256xf32>, vector<256x128xf32>, vector<16x128xf32> -> vector<16x128xf32>
    %c0_10 = arith.constant 0 : index
    %c0_11 = arith.constant 0 : index
    %22 = vector.load %arg5[%c0_10, %c0_11] : memref<16x1xf32, #tpu.memory_space<vmem>>, vector<16x1xf32>
    %23 = vector.broadcast %22 : vector<16x1xf32> to vector<16x128xf32>
    %24 = arith.addf %21, %23 : vector<16x128xf32>
    %25 = tpu.iota {dimensions = array<i32: 0>} : vector<16x128xi32>
    %c4_i32 = arith.constant 4 : i32
    %c0_i32 = arith.constant 0 : i32
    %26 = arith.cmpi eq, %c4_i32, %c0_i32 : i32
    %c1_i32 = arith.constant 1 : i32
    %27 = arith.select %26, %c1_i32, %c4_i32 : i32
    %28 = vector.broadcast %27 : i32 to vector<16x128xi32>
    %29 = arith.remsi %25, %28 : vector<16x128xi32>
    %c0_i32_12 = arith.constant 0 : i32
    %30 = vector.broadcast %c0_i32_12 : i32 to vector<16x128xi32>
    %31 = arith.cmpi ne, %29, %30 : vector<16x128xi32>
    %c0_i32_13 = arith.constant 0 : i32
    %32 = vector.broadcast %c0_i32_13 : i32 to vector<16x128xi32>
    %33 = arith.cmpi slt, %29, %32 : vector<16x128xi32>
    %c0_i32_14 = arith.constant 0 : i32
    %34 = arith.cmpi slt, %27, %c0_i32_14 : i32
    %35 = vector.broadcast %34 : i1 to vector<16x128xi1>
    %36 = vector.broadcast %35 : vector<16x128xi1> to vector<16x128xi1>
    %37 = arith.xori %33, %36 : vector<16x128xi1>
    %38 = arith.andi %37, %31 : vector<16x128xi1>
    %39 = vector.broadcast %27 : i32 to vector<16x128xi32>
    %40 = arith.addi %29, %39 : vector<16x128xi32>
    %41 = arith.select %38, %40, %29 : vector<16x128xi1>, vector<16x128xi32>
    %42 = arith.negf %24 : vector<16x128xf32>
    %43 = math.exp %42 : vector<16x128xf32>
    %cst_15 = arith.constant 1.000000e+00 : f32
    %44 = vector.broadcast %cst_15 : f32 to vector<16x128xf32>
    %45 = arith.addf %44, %43 : vector<16x128xf32>
    %46 = arith.divf %44, %45 : vector<16x128xf32>
    %cst_16 = arith.constant 1.002000e+00 : f32
    %47 = vector.broadcast %cst_16 : f32 to vector<16x128xf32>
    %48 = arith.mulf %46, %47 : vector<16x128xf32>
    %cst_17 = arith.constant 1.000000e-03 : f32
    %49 = vector.broadcast %cst_17 : f32 to vector<16x128xf32>
    %50 = arith.subf %48, %49 : vector<16x128xf32>
    %c0_i32_18 = arith.constant 0 : i32
    %51 = vector.broadcast %c0_i32_18 : i32 to vector<16x128xi32>
    %52 = arith.cmpi eq, %41, %51 : vector<16x128xi32>
    %53 = arith.select %52, %24, %50 : vector<16x128xi1>, vector<16x128xf32>
    %c0_19 = arith.constant 0 : index
    %c0_20 = arith.constant 0 : index
    %54 = vector.load %arg6[%c0_19, %c0_20] : memref<16x128xf32, #tpu.memory_space<vmem>>, vector<16x128xf32>
    tpu.vector_store %arg6[%c0_19, %c0_20], %53 {strides = array<i32>} : memref<16x128xf32, #tpu.memory_space<vmem>>, vector<16x128xf32>,
    return
  }
  func.func @transform_0(%arg0: i32) -> (i32, i32) {
    %c0_i32 = arith.constant 0 : i32
    %c0_i32_0 = arith.constant 0 : i32
    return %arg0, %c0_i32 : i32, i32
  }
  func.func @transform_1(%arg0: i32) -> (i32, i32) {
    %c0_i32 = arith.constant 0 : i32
    %c0_i32_0 = arith.constant 0 : i32
    %c0_i32_1 = arith.constant 0 : i32
    return %c0_i32, %c0_i32_0 : i32, i32
  }
  func.func @transform_2(%arg0: i32) -> (i32, i32) {
    %c0_i32 = arith.constant 0 : i32
    %c0_i32_0 = arith.constant 0 : i32
    %c0_i32_1 = arith.constant 0 : i32
    return %c0_i32, %c0_i32_0 : i32, i32
  }
  func.func @transform_3(%arg0: i32) -> (i32, i32) {
    %c0_i32 = arith.constant 0 : i32
    %c0_i32_0 = arith.constant 0 : i32
    %c0_i32_1 = arith.constant 0 : i32
    return %c0_i32, %c0_i32_0 : i32, i32
  }
  func.func @transform_4(%arg0: i32) -> (i32, i32) {
    %c0_i32 = arith.constant 0 : i32
    %c0_i32_0 = arith.constant 0 : i32
    %c0_i32_1 = arith.constant 0 : i32
    return %c0_i32, %c0_i32_0 : i32, i32
  }
  func.func @transform_5(%arg0: i32) -> (i32, i32) {
    %c0_i32 = arith.constant 0 : i32
    %c0_i32_0 = arith.constant 0 : i32
    return %c0_i32, %arg0 : i32, i32
  }
}

</mosaic_0001>

<bundles_post_ra>
// kernel: tpu_custom_call.1
= control target key start
LH: loop header
LB: loop body
LE: loop exit
PB: predicated region body
PF: predicated region fallthrough
CT: control target
= control target key end

     0   :  { %10 = vsyncpa [#allocation3], 0  ;;  %s2334_s0 = inlined_call_operand.hbm [shape: f32[128,128], index: 0, kind: input, shape index: {}]   ;;  %s2335_s1 = inlined_call_operand.vmem [shape: f32[256,128], index: 1, kind: input, shape index: {}]   ;;  %s2336_s2 = inlined_call_operand.vmem [shape: f32[256,1], index: 2, kind: input, shape index: {}]   ;;  %s2337_s3 = inlined_call_operand.hbm [shape: f32[16,256], index: 3, kind: input, shape index: {}]   ;;  %s2338_s4 = inlined_call_operand.vmem [shape: f32[16,1], index: 4, kind: input, shape index: {}]   ;;  %s2339_s5 = inlined_call_operand.hbm [shape: f32[16,128], index: 5, kind: output, shape index: {}]  }
   0x1   :  { %11 = vsyncpa [#allocation6], 0 }
   0x2   :  { %12 = vsyncpa [#allocation4], 0  ;;  %s17_s20 = sshll.u32 %s2334_s0, 4  ;;  %s1416_s21 = smov [#allocation2]   ;;  %s18_s20 = int_to_ptr.hbm [resolvable:$true] %s17_s20 }
   0x3   :  { %s19_s22 = sshll.u32 %s1416_s21, 4  ;;  %s34_s25 = sshll.u32 %s2337_s3, 4  ;;  %s20_s22 = int_to_ptr.vmem [resolvable:$true] %s19_s22  ;;  %s35_s25 = int_to_ptr.hbm [resolvable:$true] %s34_s25 }
   0x4   :  { %s1417_s26 = smov 128   ;;  %s1418_s27 = smov 8  }
   0x5   :  { %25 = dma.hbm_to_vmem [thread:$0]  %s18_s20, 2048, %s20_s22, [#allocation3], %s1417_s26, %s1417_s26, %s1418_s27  }
   0x6   :  { %s1419_s28 = smov [#allocation5]   ;;  %s1420_s30 = smov 256  }
   0x7   :  { %s36_s29 = sshll.u32 %s1419_s28, 4  ;;  %s1421_s0 = smov 16   ;;  %s37_s29 = int_to_ptr.vmem [resolvable:$true] %s36_s29 }
   0x8   :  { %42 = dma.hbm_to_vmem [thread:$0]  %s35_s25, 512, %s37_s29, [#allocation6], %s1420_s30, %s1420_s30, %s1421_s0  }
   0x9   :  { %1410 = dma.done.wait [#allocation3], 2048  }
   0xa   :  { %1411 = vsyncadd [#allocation3], 4294965248 }
   0xb   :  { %1412 = dma.done.wait [#allocation6], 512  }
   0xc   :  { %1413 = vsyncadd [#allocation6], 4294966784  ;;  %v1422_v0 = vmov 0   ;;  %v100_v1 = vld [vmem:[#allocation2 + $0x78] sm:$0xff]  ;;  %v99_v4 = vld [vmem:[#allocation2 + $0x70] sm:$0xff]  ;;  %s1125_s12 = sshll.u32 %s2339_s5, 4  ;;  %s1126_s12 = int_to_ptr.hbm [resolvable:$true] %s1125_s12 }
   0xd   :  { %1200 = vset.pattern.permute.xlu1 %v1422_v0  ;;  %1199 = vset.pattern.permute.xlu0 %v1422_v0  ;;  %v116_v2 = vld [vmem:[%s2336_s2 + $0x78] sm:$0xff]  ;;  %v98_v5 = vld [vmem:[#allocation2 + $0x68] sm:$0xff]  ;;  %v115_v6 = vld [vmem:[%s2336_s2 + $0x70] sm:$0xff] }
   0xe   :  { %1201 = vset.pattern.permute.xlu2 %v1422_v0  ;;  %293 = vmatpush.xpose.msra.mxu0 %v100_v1  ;;  %v132_v3 = vld [vmem:[%s2336_s2 + $0xf8] sm:$0xff]  ;;  %v130_v7 = vld [vmem:[%s2336_s2 + $0xe8] sm:$0xff]  ;;  %v131_v8 = vld [vmem:[%s2336_s2 + $0xf0] sm:$0xff] }
   0xf   :  { %1143 = vmatpush.xpose.msra.mxu1 %v100_v1  ;;  %1144 = vmatpush.xpose.msra.mxu2 %v100_v1  ;;  %v97_v9 = vld [vmem:[#allocation2 + $0x60] sm:$0xff]  ;;  %v96_v11 = vld [vmem:[#allocation2 + $0x58] sm:$0xff]  ;;  %v114_v13 = vld [vmem:[%s2336_s2 + $0x68] sm:$0xff] }
  0x10   :  { %1145 = vmatpush.xpose.msra.mxu3 %v100_v1  ;;  %210 = vperm.xlu1 %1200, %v116_v2   ;;  %v129_v10 = vld [vmem:[%s2336_s2 + $0xe0] sm:$0xff]  ;;  %v128_v12 = vld [vmem:[%s2336_s2 + $0xd8] sm:$0xff]  ;;  %v95_v14 = vld [vmem:[#allocation2 + $0x50] sm:$0xff] }
  0x11   :  { %290 = vperm.xlu0 %1199, %v132_v3   ;;  %205 = vperm.xlu2 %1201, %v115_v6   ;;  %v113_v15 = vld [vmem:[%s2336_s2 + $0x60] sm:$0xff]  ;;  %v94_v16 = vld [vmem:[#allocation2 + $0x48] sm:$0xff]  ;;  %v112_v17 = vld [vmem:[%s2336_s2 + $0x58] sm:$0xff] }
  0x12   :  { %294 = vmatpush.xpose.msra.mxu0 %v99_v4  ;;  %v127_v18 = vld [vmem:[%s2336_s2 + $0xd0] sm:$0xff]  ;;  %v93_v19 = vld [vmem:[#allocation2 + $0x40] sm:$0xff]  ;;  %v126_v20 = vld [vmem:[%s2336_s2 + $0xc8] sm:$0xff] }
  0x13   :  { %1146 = vmatpush.xpose.msra.mxu1 %v99_v4  ;;  %1147 = vmatpush.xpose.msra.mxu2 %v99_v4  ;;  %v92_v21 = vld [vmem:[#allocation2 + $0x38] sm:$0xff]  ;;  %v125_v22 = vld [vmem:[%s2336_s2 + $0xc0] sm:$0xff]  ;;  %v111_v23 = vld [vmem:[%s2336_s2 + $0x50] sm:$0xff] }
  0x14   :  { %1148 = vmatpush.xpose.msra.mxu3 %v99_v4  ;;  %v91_v24 = vld [vmem:[#allocation2 + $0x30] sm:$0xff]  ;;  %v110_v25 = vld [vmem:[%s2336_s2 + $0x48] sm:$0xff]  ;;  %v109_v27 = vld [vmem:[%s2336_s2 + $0x40] sm:$0xff] }
  0x15   :  { %v90_v26 = vld [vmem:[#allocation2 + $0x28] sm:$0xff]  ;;  %v124_v28 = vld [vmem:[%s2336_s2 + $0xb8] sm:$0xff]  ;;  %v89_v29 = vld [vmem:[#allocation2 + $0x20] sm:$0xff] }
  0x16   :  { %295 = vmatpush.xpose.msra.mxu0 %v98_v5  ;;  %v123_v30 = vld [vmem:[%s2336_s2 + $0xb0] sm:$0xff]  ;;  %v88_v31 = vld [vmem:[#allocation2 + $0x18] sm:$0xff]  ;;  %v122_v32 = vld [vmem:[%s2336_s2 + $0xa8] sm:$0xff] }
  0x17   :  { %1149 = vmatpush.xpose.msra.mxu1 %v98_v5  ;;  %1150 = vmatpush.xpose.msra.mxu2 %v98_v5  ;;  %v108_v33 = vld [vmem:[%s2336_s2 + $0x38] sm:$0xff]  ;;  %v87_v34 = vld [vmem:[#allocation2 + $0x10] sm:$0xff]  ;;  %v86_v36 = vld [vmem:[#allocation2 + $0x8] sm:$0xff] }
  0x18   :  { %1151 = vmatpush.xpose.msra.mxu3 %v98_v5  ;;  %280 = vperm.xlu1 %1200, %v130_v7   ;;  %v107_v35 = vld [vmem:[%s2336_s2 + $0x30] sm:$0xff]  ;;  %v106_v37 = vld [vmem:[%s2336_s2 + $0x28] sm:$0xff]  ;;  %v121_v38 = vld [vmem:[%s2336_s2 + $0xa0] sm:$0xff] }
  0x19   :  { %285 = vperm.xlu0 %1199, %v131_v8   ;;  %275 = vperm.xlu2 %1201, %v129_v10   ;;  %v85_v39 = vld [vmem:[#allocation2] sm:$0xff]  ;;  %v62_v41 = vld [vmem:[%s2335_s1 + $0x48] sm:$0xff]  ;;  %v76_v43 = vld [vmem:[%s2335_s1 + $0xb8] sm:$0xff] }
  0x1a   :  { %296 = vmatpush.xpose.msra.mxu0 %v97_v9  ;;  %v53_v40 = vld [vmem:[%s2335_s1] sm:$0xff]  ;;  %v120_v44 = vld [vmem:[%s2336_s2 + $0x98] sm:$0xff]  ;;  %v119_v45 = vld [vmem:[%s2336_s2 + $0x90] sm:$0xff] }
  0x1b   :  { %1152 = vmatpush.xpose.msra.mxu1 %v97_v9  ;;  %1153 = vmatpush.xpose.msra.mxu2 %v97_v9  ;;  %v69_v42 = vld [vmem:[%s2335_s1 + $0x80] sm:$0xff]  ;;  %v54_v47 = vld [vmem:[%s2335_s1 + $0x8] sm:$0xff]  ;;  %v63_v48 = vld [vmem:[%s2335_s1 + $0x50] sm:$0xff] }
  0x1c   :  { %1154 = vmatpush.xpose.msra.mxu3 %v97_v9  ;;  %v105_v46 = vld [vmem:[%s2336_s2 + $0x20] sm:$0xff]  ;;  %v70_v49 = vld [vmem:[%s2335_s1 + $0x88] sm:$0xff]  ;;  %v104_v51 = vld [vmem:[%s2336_s2 + $0x18] sm:$0xff] }
  0x1d   :  { %v77_v50 = vld [vmem:[%s2335_s1 + $0xc0] sm:$0xff]  ;;  %v103_v52 = vld [vmem:[%s2336_s2 + $0x10] sm:$0xff]  ;;  %v118_v53 = vld [vmem:[%s2336_s2 + $0x88] sm:$0xff] }
  0x1e   :  { %297 = vmatpush.xpose.msra.mxu0 %v96_v11  ;;  %v55_v54 = vld [vmem:[%s2335_s1 + $0x10] sm:$0xff]  ;;  %v64_v55 = vld [vmem:[%s2335_s1 + $0x58] sm:$0xff]  ;;  %v78_v57 = vld [vmem:[%s2335_s1 + $0xc8] sm:$0xff] }
  0x1f   :  { %1155 = vmatpush.xpose.msra.mxu1 %v96_v11  ;;  %1156 = vmatpush.xpose.msra.mxu2 %v96_v11  ;;  %v71_v56 = vld [vmem:[%s2335_s1 + $0x90] sm:$0xff]  ;;  %v117_v58 = vld [vmem:[%s2336_s2 + $0x80] sm:$0xff]  ;;  %v102_v60 = vld [vmem:[%s2336_s2 + $0x8] sm:$0xff] }
  0x20   :  { %1157 = vmatpush.xpose.msra.mxu3 %v96_v11  ;;  %270 = vperm.xlu1 %1200, %v128_v12   ;;  %v101_v59 = vld [vmem:[%s2336_s2] sm:$0xff]  ;;  %v56_v61 = vld [vmem:[%s2335_s1 + $0x18] sm:$0xff]  ;;  %v79_v0 = vld [vmem:[%s2335_s1 + $0xd0] sm:$0xff] }
  0x21   :  { %200 = vperm.xlu0 %1199, %v114_v13   ;;  %195 = vperm.xlu2 %1201, %v113_v15   ;;  %v65_v62 = vld [vmem:[%s2335_s1 + $0x60] sm:$0xff]  ;;  %v72_v63 = vld [vmem:[%s2335_s1 + $0x98] sm:$0xff]  ;;  %v987_v1 = vld [vmem:[%s2338_s4 + $0x8] sm:$0xff] }
  0x22   :  { %298 = vmatpush.xpose.msra.mxu0 %v95_v14  ;;  %v57_v2 = vld [vmem:[%s2335_s1 + $0x20] sm:$0xff]  ;;  %v66_v3 = vld [vmem:[%s2335_s1 + $0x68] sm:$0xff]  ;;  %v80_v5 = vld [vmem:[%s2335_s1 + $0xd8] sm:$0xff] }
  0x23   :  { %1158 = vmatpush.xpose.msra.mxu1 %v95_v14  ;;  %1159 = vmatpush.xpose.msra.mxu2 %v95_v14  ;;  %v73_v4 = vld [vmem:[%s2335_s1 + $0xa0] sm:$0xff]  ;;  %v58_v7 = vld [vmem:[%s2335_s1 + $0x28] sm:$0xff]  ;;  %v67_v8 = vld [vmem:[%s2335_s1 + $0x70] sm:$0xff] }
  0x24   :  { %1160 = vmatpush.xpose.msra.mxu3 %v95_v14  ;;  %v986_v6 = vld [vmem:[%s2338_s4] sm:$0xff]  ;;  %v74_v9 = vld [vmem:[%s2335_s1 + $0xa8] sm:$0xff]  ;;  %v59_v12 = vld [vmem:[%s2335_s1 + $0x30] sm:$0xff] }
  0x25   :  { %v81_v10 = vld [vmem:[%s2335_s1 + $0xe0] sm:$0xff]  ;;  %v68_v13 = vld [vmem:[%s2335_s1 + $0x78] sm:$0xff]  ;;  %v75_v14 = vld [vmem:[%s2335_s1 + $0xb0] sm:$0xff] }
  0x26   :  { %299 = vmatpush.xpose.msra.mxu0 %v94_v16  ;;  %v82_v15 = vld [vmem:[%s2335_s1 + $0xe8] sm:$0xff] }
  0x27   :  { %1161 = vmatpush.xpose.msra.mxu1 %v94_v16  ;;  %1162 = vmatpush.xpose.msra.mxu2 %v94_v16 }
  0x28   :  { %1163 = vmatpush.xpose.msra.mxu3 %v94_v16  ;;  %190 = vperm.xlu1 %1200, %v112_v17   ;;  %v60_v17 = vld [vmem:[%s2335_s1 + $0x38] sm:$0xff] }
  0x29   :  { %265 = vperm.xlu0 %1199, %v127_v18   ;;  %260 = vperm.xlu2 %1201, %v126_v20  }
  0x2a   :  { %300 = vmatpush.xpose.msra.mxu0 %v93_v19 }
  0x2b   :  { %1164 = vmatpush.xpose.msra.mxu1 %v93_v19  ;;  %1165 = vmatpush.xpose.msra.mxu2 %v93_v19 }
  0x2c   :  { %1166 = vmatpush.xpose.msra.mxu3 %v93_v19  ;;  %v83_v19 = vld [vmem:[%s2335_s1 + $0xf0] sm:$0xff] }
  0x2e   :  { %301 = vmatpush.xpose.msra.mxu0 %v92_v21 }
  0x2f   :  { %1167 = vmatpush.xpose.msra.mxu1 %v92_v21  ;;  %1168 = vmatpush.xpose.msra.mxu2 %v92_v21 }
  0x30   :  { %1169 = vmatpush.xpose.msra.mxu3 %v92_v21  ;;  %255 = vperm.xlu1 %1200, %v125_v22   ;;  %v61_v22 = vld [vmem:[%s2335_s1 + $0x40] sm:$0xff] }
  0x31   :  { %185 = vperm.xlu0 %1199, %v111_v23   ;;  %180 = vperm.xlu2 %1201, %v110_v25  }
  0x32   :  { %302 = vmatpush.xpose.msra.mxu0 %v91_v24 }
  0x33   :  { %1170 = vmatpush.xpose.msra.mxu1 %v91_v24  ;;  %1171 = vmatpush.xpose.msra.mxu2 %v91_v24 }
  0x34   :  { %1172 = vmatpush.xpose.msra.mxu3 %v91_v24  ;;  %v84_v24 = vld [vmem:[%s2335_s1 + $0xf8] sm:$0xff]  ;;  %s1423_s1 = smov [#allocation7]  }
  0x35   :  { %s1123_s9 = sshll.u32 %s1423_s1, 4  ;;  %s1124_s9 = int_to_ptr.vmem [resolvable:$true] %s1123_s9 }
  0x36   :  { %303 = vmatpush.xpose.msra.mxu0 %v90_v26 }
  0x37   :  { %1173 = vmatpush.xpose.msra.mxu1 %v90_v26  ;;  %1174 = vmatpush.xpose.msra.mxu2 %v90_v26 }
  0x38   :  { %1175 = vmatpush.xpose.msra.mxu3 %v90_v26  ;;  %175 = vperm.xlu1 %1200, %v109_v27  }
  0x39   :  { %250 = vperm.xlu0 %1199, %v124_v28   ;;  %245 = vperm.xlu2 %1201, %v123_v30  }
  0x3a   :  { %304 = vmatpush.xpose.msra.mxu0 %v89_v29 }
  0x3b   :  { %1176 = vmatpush.xpose.msra.mxu1 %v89_v29  ;;  %1177 = vmatpush.xpose.msra.mxu2 %v89_v29 }
  0x3c   :  { %1178 = vmatpush.xpose.msra.mxu3 %v89_v29 }
  0x3e   :  { %305 = vmatpush.xpose.msra.mxu0 %v88_v31 }
  0x3f   :  { %1179 = vmatpush.xpose.msra.mxu1 %v88_v31  ;;  %1180 = vmatpush.xpose.msra.mxu2 %v88_v31 }
  0x40   :  { %1181 = vmatpush.xpose.msra.mxu3 %v88_v31  ;;  %240 = vperm.xlu1 %1200, %v122_v32  }
  0x41   :  { %170 = vperm.xlu0 %1199, %v108_v33   ;;  %165 = vperm.xlu2 %1201, %v107_v35  }
  0x42   :  { %306 = vmatpush.xpose.msra.mxu0 %v87_v34 }
  0x43   :  { %1182 = vmatpush.xpose.msra.mxu1 %v87_v34  ;;  %1183 = vmatpush.xpose.msra.mxu2 %v87_v34 }
  0x44   :  { %1184 = vmatpush.xpose.msra.mxu3 %v87_v34 }
  0x46   :  { %307 = vmatpush.xpose.msra.mxu0 %v86_v36 }
  0x47   :  { %1185 = vmatpush.xpose.msra.mxu1 %v86_v36  ;;  %1186 = vmatpush.xpose.msra.mxu2 %v86_v36 }
  0x48   :  { %1187 = vmatpush.xpose.msra.mxu3 %v86_v36  ;;  %160 = vperm.xlu1 %1200, %v106_v37  }
  0x49   :  { %235 = vperm.xlu0 %1199, %v121_v38   ;;  %230 = vperm.xlu2 %1201, %v120_v44  }
  0x4a   :  { %308 = vmatpush.xpose.msra.mxu0 %v85_v39 }
  0x4b   :  { %1188 = vmatpush.xpose.msra.mxu1 %v85_v39  ;;  %1189 = vmatpush.xpose.msra.mxu2 %v85_v39 }
  0x4c   :  { %1190 = vmatpush.xpose.msra.mxu3 %v85_v39 }
  0x4d   :  { %309 = vmatmul.f32.vlgmr.msra.gmra.mxu0 %v53_v40 }
  0x4e   :  { %336 = vmatmul.f32.vlgmr.msra.gmra.mxu1 %v62_v41  ;;  %357 = vmatmul.f32.vlgmr.msra.gmra.mxu2 %v69_v42 }
  0x4f   :  { %378 = vmatmul.f32.vlgmr.msra.gmra.mxu3 %v76_v43 }
  0x50   :  { %225 = vperm.xlu1 %1200, %v119_v45  }
  0x51   :  { %155 = vperm.xlu0 %1199, %v105_v46   ;;  %150 = vperm.xlu2 %1201, %v104_v51  }
  0x55   :  { %312 = vmatmul.f32.gmra.mxu0 %v54_v47 }
  0x56   :  { %339 = vmatmul.f32.gmra.mxu1 %v63_v48  ;;  %360 = vmatmul.f32.gmra.mxu2 %v70_v49 }
  0x57   :  { %381 = vmatmul.f32.gmra.mxu3 %v77_v50 }
  0x58   :  { %145 = vperm.xlu1 %1200, %v103_v52  }
  0x59   :  { %220 = vperm.xlu0 %1199, %v118_v53   ;;  %215 = vperm.xlu2 %1201, %v117_v58  }
  0x5d   :  { %315 = vmatmul.f32.gmra.mxu0 %v55_v54 }
  0x5e   :  { %342 = vmatmul.f32.gmra.mxu1 %v64_v55  ;;  %363 = vmatmul.f32.gmra.mxu2 %v71_v56 }
  0x5f   :  { %384 = vmatmul.f32.gmra.mxu3 %v78_v57 }
  0x60   :  { %135 = vperm.xlu1 %1200, %v101_v59  }
  0x61   :  { %140 = vperm.xlu0 %1199, %v102_v60   ;;  %990 = vperm.xlu2 %1201, %v986_v6  }
  0x65   :  { %318 = vmatmul.f32.gmra.mxu0 %v56_v61 }
  0x66   :  { %345 = vmatmul.f32.gmra.mxu1 %v65_v62  ;;  %366 = vmatmul.f32.gmra.mxu2 %v72_v63 }
  0x67   :  { %387 = vmatmul.f32.gmra.mxu3 %v79_v0 }
  0x69   :  { %995 = vperm.xlu0 %1199, %v987_v1  }
  0x6b   :  { %v1637_v11 = vpop.permute.xlu2 %205 }
  0x6d   :  { %321 = vmatmul.f32.gmra.mxu0 %v57_v2 }
  0x6e   :  { %348 = vmatmul.f32.gmra.mxu1 %v66_v3  ;;  %369 = vmatmul.f32.gmra.mxu2 %v73_v4 }
  0x6f   :  { %390 = vmatmul.f32.gmra.mxu3 %v80_v5 }
  0x73   :  { %v1661_v20 = vpop.permute.xlu2 %275 }
  0x75   :  { %324 = vmatmul.f32.gmra.mxu0 %v58_v7 }
  0x76   :  { %351 = vmatmul.f32.gmra.mxu1 %v67_v8  ;;  %372 = vmatmul.f32.gmra.mxu2 %v74_v9 }
  0x77   :  { %393 = vmatmul.f32.gmra.mxu3 %v81_v10 }
  0x7b   :  { %v1673_v25 = vpop.permute.xlu2 %195 }
  0x7d   :  { %327 = vmatmul.f32.gmra.mxu0 %v59_v12 }
  0x7e   :  { %354 = vmatmul.f32.gmra.mxu1 %v68_v13  ;;  %375 = vmatmul.f32.gmra.mxu2 %v75_v14 }
  0x7f   :  { %396 = vmatmul.f32.gmra.mxu3 %v82_v15 }
  0x82   :  { %v1651_v16 = vpop.permute.xlu1 %210 }
  0x83   :  { %v1656_v18 = vpop.permute.xlu0 %290  ;;  %v1679_v28 = vpop.permute.xlu2 %260 }
  0x85   :  { %330 = vmatmul.f32.gmra.mxu0 %v60_v17 }
  0x87   :  { %399 = vmatmul.f32.gmra.mxu3 %v83_v19 }
  0x8a   :  { %v1663_v21 = vpop.permute.xlu1 %280 }
  0x8b   :  { %v1668_v23 = vpop.permute.xlu0 %285  ;;  %v181_v31 = vpop.permute.xlu2 %180 }
  0x8d   :  { %333 = vmatmul.f32.gmra.mxu0 %v61_v22 }
  0x8f   :  { %402 = vmatmul.f32.gmra.mxu3 %v84_v24 }
  0x92   :  { %v1675_v26 = vpop.permute.xlu1 %270 }
  0x93   :  { %v1677_v27 = vpop.permute.xlu0 %200  ;;  %v1685_v36 = vpop.permute.xlu2 %245 }
  0x9a   :  { %v191_v29 = vpop.permute.xlu1 %190 }
  0x9b   :  { %v1681_v30 = vpop.permute.xlu0 %265  ;;  %v1691_v39 = vpop.permute.xlu2 %165 }
  0xa2   :  { %v256_v32 = vpop.permute.xlu1 %255 }
  0xa3   :  { %v186_v33 = vpop.permute.xlu0 %185  ;;  %v1697_v42 = vpop.permute.xlu2 %230 }
  0xaa   :  { %v1683_v34 = vpop.permute.xlu1 %175 }
  0xab   :  { %v251_v35 = vpop.permute.xlu0 %250  ;;  %v1701_v45 = vpop.permute.xlu2 %150 }
  0xb2   :  { %v1687_v37 = vpop.permute.xlu1 %240 }
  0xb3   :  { %v1689_v38 = vpop.permute.xlu0 %170  ;;  %v216_v63 = vpop.permute.xlu2 %215 }
  0xba   :  { %v1693_v40 = vpop.permute.xlu1 %160 }
  0xbb   :  { %v1695_v41 = vpop.permute.xlu0 %235 }
  0xc2   :  { %v226_v43 = vpop.permute.xlu1 %225 }
  0xc3   :  { %v1699_v44 = vpop.permute.xlu0 %155 }
  0xca   :  { %v146_v46 = vpop.permute.xlu1 %145  ;;  %v310_v47 = vpop.f32.mrf.mxu0 }
  0xcb   :  { %v337_v48 = vpop.f32.mrf.mxu1  ;;  %v221_v49 = vpop.permute.xlu0 %220 }
  0xcc   :  { %v1703_v50 = vadd.f32 %v337_v48, %v181_v31 }
  0xce   :  { %v511_v51 = vand.u32 2147483647, %v1703_v50  ;;  %vm447_vm7 = vcmp.ne.f32.partialorder %v1703_v50, %v1703_v50 }
  0xd0   :  { %v543_v54 = vsub.f32 0.0, %v511_v51 }
  0xd1   :  { %v358_v52 = vpop.f32.mrf.mxu2 }
  0xd2   :  { %v379_v53 = vpop.f32.mrf.mxu3  ;;  %v136_v55 = vpop.permute.xlu1 %135  ;;  %v584_v0 = vmul.f32 1.442695, %v543_v54  ;;  %v1716_v3 = vadd.f32 %v358_v52, %v216_v63 }
  0xd3   :  { %v313_v56 = vpop.f32.mrf.mxu0  ;;  %v340_v57 = vpop.f32.mrf.mxu1  ;;  %v1706_v59 = vadd.f32 %v379_v53, %v251_v35  ;;  %v1710_v61 = vadd.f32 %v310_v47, %v136_v55 }
  0xd4   :  { %v141_v58 = vpop.permute.xlu0 %140  ;;  %v1708_v60 = vadd.f32 %v340_v57, %v186_v33  ;;  %2365 = vst [vmem:[#allocation12_spill] sm:$0xff] %v1716_v3  ;;  %1202 = vpow2.f32 %v584_v0  ;;  %v518_v17 = vand.u32 2147483647, %v1716_v3 }
  0xd5   :  { %2364 = vst [vmem:[#allocation11_spill] sm:$0xff] %v1706_v59  ;;  %v1712_v62 = vadd.f32 %v313_v56, %v141_v58  ;;  %v525_v2 = vand.u32 2147483647, %v1706_v59  ;;  %v502_v4 = vand.u32 2147483647, %v1710_v61 }
  0xd6   :  { %v512_v1 = vand.u32 2147483647, %v1708_v60  ;;  %vm448_vm6 = vcmp.ne.f32.partialorder %v1708_v60, %v1708_v60  ;;  %v2392_v59 = vmax.f32 %v1708_v60, 0.0 }
  0xd7   :  { %v503_v7 = vand.u32 2147483647, %v1712_v62  ;;  %v557_v13 = vsub.f32 0.0, %v525_v2  ;;  %v534_v19 = vsub.f32 0.0, %v502_v4 }
  0xd8   :  { %v544_v8 = vsub.f32 0.0, %v512_v1 }
  0xd9   :  { %v361_v5 = vpop.f32.mrf.mxu2  ;;  %v535_v22 = vsub.f32 0.0, %v503_v7  ;;  %v612_v48 = vmul.f32 1.442695, %v557_v13  ;;  %v566_v51 = vmul.f32 1.442695, %v534_v19 }
  0xda   :  { %v382_v6 = vpop.f32.mrf.mxu3  ;;  %v1720_v10 = vadd.f32 %v361_v5, %v221_v49  ;;  %v586_v31 = vmul.f32 1.442695, %v544_v8  ;;  %v1731_v47 = vpop.eup %1202 }
  0xdb   :  { %v316_v9 = vpop.f32.mrf.mxu0  ;;  %v343_v12 = vpop.f32.mrf.mxu1  ;;  %v1722_v14 = vadd.f32 %v382_v6, %v256_v32  ;;  %v550_v32 = vsub.f32 0.0, %v518_v17  ;;  %v711_v0 = vadd.f32 1.0, %v1731_v47 }
  0xdc   :  { %2366 = vst [vmem:[#allocation13_spill] sm:$0xff] %v1720_v10  ;;  %v1724_v15 = vadd.f32 %v343_v12, %v191_v29  ;;  %v1727_v24 = vadd.f32 %v316_v9, %v146_v46  ;;  %v519_v35 = vand.u32 2147483647, %v1720_v10  ;;  %v568_v29 = vmul.f32 1.442695, %v535_v22 }
  0xdd   :  { %2367 = vst [vmem:[#allocation14_spill] sm:$0xff] %v1722_v14  ;;  %v526_v49 = vand.u32 2147483647, %v1722_v14  ;;  %1204 = vpow2.f32 %v586_v31  ;;  %v598_v2 = vmul.f32 1.442695, %v550_v32  ;;  %v714_v12 = vmul.f32 -0.5, %v1731_v47 }
  0xde   :  { %v513_v33 = vand.u32 2147483647, %v1724_v15  ;;  %v504_v52 = vand.u32 2147483647, %v1727_v24  ;;  %v551_v58 = vsub.f32 0.0, %v519_v35  ;;  %1206 = vpow2.f32 %v612_v48 }
  0xdf   :  { %v558_v1 = vsub.f32 0.0, %v526_v49  ;;  %1208 = vpow2.f32 %v566_v51  ;;  %vm449_vm4 = vcmp.ne.f32.partialorder %v1724_v15, %v1724_v15 }
  0xe0   :  { %v545_v46 = vsub.f32 0.0, %v513_v33  ;;  %v536_v5 = vsub.f32 0.0, %v504_v52  ;;  %1210 = vpow2.f32 %v568_v29  ;;  %v600_v9 = vmul.f32 1.442695, %v551_v58 }
  0xe1   :  { %v364_v53 = vpop.f32.mrf.mxu2  ;;  %1212 = vlog2.f32 %v711_v0  ;;  %v614_v17 = vmul.f32 1.442695, %v558_v1 }
  0xe2   :  { %v385_v54 = vpop.f32.mrf.mxu3  ;;  %v1735_v55 = vadd.f32 %v364_v53, %v226_v43  ;;  %1214 = vpow2.f32 %v598_v2  ;;  %v570_v22 = vmul.f32 1.442695, %v536_v5 }
  0xe3   :  { %v1738_v56 = vadd.f32 %v385_v54, %v1679_v28  ;;  %v319_v57 = vpop.f32.mrf.mxu0  ;;  %v346_v63 = vpop.f32.mrf.mxu1  ;;  %v588_v28 = vmul.f32 1.442695, %v545_v46 }
  0xe4   :  { %2368 = vst [vmem:[#allocation15_spill] sm:$0xff] %v1735_v55  ;;  %v1742_v4 = vadd.f32 %v346_v63, %v1673_v25  ;;  %v1745_v6 = vadd.f32 %v319_v57, %v1701_v45  ;;  %v520_v7 = vand.u32 2147483647, %v1735_v55  ;;  %v717_v25 = vand.u32 2147483647, %v1731_v47  ;;  %v1752_v13 = vpop.eup %1204 }
  0xe5   :  { %v527_v45 = vand.u32 2147483647, %v1738_v56  ;;  %v723_v49 = vmul.f32 -0.5, %v1752_v13  ;;  %v1758_v32 = vpop.eup %1206  ;;  %1216 = vpow2.f32 %v588_v28  ;;  %v715_v63 = vadd.f32 1.0, %v714_v12 }
  0xe6   :  { %v514_v8 = vand.u32 2147483647, %v1742_v4  ;;  %v505_v31 = vand.u32 2147483647, %v1745_v6  ;;  %v552_v51 = vsub.f32 0.0, %v520_v7  ;;  %v1766_v54 = vpop.eup %1208  ;;  %1218 = vpow2.f32 %v600_v9 }
  0xe7   :  { %v1769_v0 = vpop.eup %1210  ;;  %1220 = vpow2.f32 %v614_v17  ;;  %v559_v1 = vsub.f32 0.0, %v527_v45  ;;  %vm1774_vm0 = vcmp.lt.f32.partialorder %v717_v25, 0.0004427343  ;;  %v720_v7 = vadd.f32 1.0, %v1752_v13 }
  0xe8   :  { %v546_v19 = vsub.f32 0.0, %v514_v8  ;;  %v537_v5 = vsub.f32 0.0, %v505_v31  ;;  %v724_v8 = vadd.f32 1.0, %v723_v49  ;;  %1222 = vpow2.f32 %v570_v22 }
  0xe9   :  { %v367_v33 = vpop.f32.mrf.mxu2  ;;  %v602_v12 = vmul.f32 1.442695, %v552_v51  ;;  %v616_v31 = vmul.f32 1.442695, %v559_v1  ;;  %v716_v49 = vmul.f32 %v1731_v47, %v715_v63  ;;  %vm450_vm3 = vcmp.ne.f32.partialorder %v1742_v4, %v1742_v4 }
  0xea   :  { %v388_v35 = vpop.f32.mrf.mxu3  ;;  %v1761_v29 = vadd.f32 %v367_v33, %v1697_v42  ;;  %v590_v46 = vmul.f32 1.442695, %v546_v19  ;;  %v726_v19 = vand.u32 2147483647, %v1752_v13  ;;  %v572_v51 = vmul.f32 1.442695, %v537_v5 }
  0xeb   :  { %v1764_v52 = vadd.f32 %v388_v35, %v1681_v30  ;;  %v322_v53 = vpop.f32.mrf.mxu0  ;;  %v349_v57 = vpop.f32.mrf.mxu1 }
  0xec   :  { %2369 = vst [vmem:[#allocation16_spill] sm:$0xff] %v1761_v29  ;;  %v1772_v2 = vadd.f32 %v349_v57, %v1677_v27  ;;  %v1213_v30 = vpop.eup %1212  ;;  %v1779_v28 = vadd.f32 %v322_v53, %v1699_v44  ;;  %v521_v17 = vand.u32 2147483647, %v1761_v29  ;;  %1224 = vpow2.f32 %v590_v46 }
  0xed   :  { %v1782_v9 = vpop.eup %1214  ;;  %v528_v25 = vand.u32 2147483647, %v1764_v52  ;;  %v713_v35 = vmul.f32 0.6931472, %v1213_v30  ;;  %1226 = vlog2.f32 %v720_v7  ;;  %vm1823_vm1 = vcmp.lt.f32.partialorder %v726_v19, 0.0004427343 }
  0xee   :  { %2372 = vst [vmem:[#allocation17_spill] sm:$0xff] %v1782_v9  ;;  %v515_v27 = vand.u32 2147483647, %v1772_v2  ;;  %v1789_v44 = vpop.eup %1216  ;;  %v506_v53 = vand.u32 2147483647, %v1779_v28  ;;  %1228 = vpow2.f32 %v602_v12  ;;  %v553_v48 = vsub.f32 0.0, %v521_v17 }
  0xef   :  { %v1792_v22 = vpop.eup %1218  ;;  %v732_v43 = vmul.f32 -0.5, %v1789_v44  ;;  %v560_v47 = vsub.f32 0.0, %v528_v25  ;;  %v729_v3 = vadd.f32 1.0, %v1789_v44  ;;  %1230 = vpow2.f32 %v616_v31 }
  0xf0   :  { %v547_v33 = vsub.f32 0.0, %v515_v27  ;;  %2373 = vst [vmem:[#allocation18_spill] sm:$0xff] %v1792_v22  ;;  %v1796_v45 = vpop.eup %1220  ;;  %v719_v17 = vsel %vm1774_vm0, %v716_v49, %v713_v35  ;;  %v538_v25 = vsub.f32 0.0, %v506_v53  ;;  %vm451_vm9 = vcmp.ne.f32.partialorder %v1772_v2, %v1772_v2 }
  0xf1   :  { %v370_v57 = vpop.f32.mrf.mxu2  ;;  %v1808_v7 = vpop.eup %1222  ;;  %v618_v42 = vmul.f32 1.442695, %v560_v47 }
  0xf2   :  { %v391_v46 = vpop.f32.mrf.mxu3  ;;  %v592_v58 = vmul.f32 1.442695, %v547_v33  ;;  %v1799_v1 = vadd.f32 %v370_v57, %v1695_v41  ;;  %v1814_v41 = vmul.f32 %v1752_v13, %v724_v8  ;;  %v733_v33 = vadd.f32 1.0, %v732_v43 }
  0xf3   :  { %v325_v30 = vpop.f32.mrf.mxu0  ;;  %v1802_v63 = vadd.f32 %v391_v46, %v1675_v26  ;;  %v352_v27 = vpop.f32.mrf.mxu1  ;;  %v604_v57 = vmul.f32 1.442695, %v553_v48  ;;  %v574_v53 = vmul.f32 1.442695, %v538_v25 }
  0xf4   :  { %2374 = vst [vmem:[#allocation19_spill] sm:$0xff] %v1799_v1  ;;  %v1805_v5 = vadd.f32 %v325_v30, %v1693_v40  ;;  %v1811_v12 = vadd.f32 %v352_v27, %v1637_v11  ;;  %v1818_v26 = vpop.eup %1224  ;;  %1232 = vpow2.f32 %v592_v58  ;;  %v522_v40 = vand.u32 2147483647, %v1799_v1 }
  0xf5   :  { %1234 = vpow2.f32 %v572_v51  ;;  %v1227_v13 = vpop.eup %1226  ;;  %v529_v8 = vand.u32 2147483647, %v1802_v63  ;;  %v738_v48 = vadd.f32 1.0, %v1818_v26  ;;  %v741_v49 = vmul.f32 -0.5, %v1818_v26 }
  0xf6   :  { %v516_v31 = vand.u32 2147483647, %v1811_v12  ;;  %v507_v35 = vand.u32 2147483647, %v1805_v5  ;;  %1236 = vlog2.f32 %v729_v3  ;;  %v1829_v58 = vpop.eup %1228  ;;  %v2378_v51 = vmax.f32 %v1703_v50, 0.0 }
  0xf7   :  { %2377 = vst [vmem:[#allocation20_spill] sm:$0xff] %v1829_v58  ;;  %v554_v30 = vsub.f32 0.0, %v522_v40  ;;  %v1838_v11 = vmul.f32 %v1789_v44, %v733_v33  ;;  %v735_v3 = vand.u32 2147483647, %v1789_v44  ;;  %v1841_v10 = vpop.eup %1230  ;;  %1238 = vpow2.f32 %v604_v57 }
  0xf8   :  { %v548_v43 = vsub.f32 0.0, %v516_v31  ;;  %v1835_v19 = vadd.f32 %v719_v17, %v2378_v51  ;;  %v1849_v51 = vmul.f32 0.6931472, %v1227_v13  ;;  %v561_v40 = vsub.f32 0.0, %v529_v8 }
  0xf9   :  { %v373_v27 = vpop.f32.mrf.mxu2  ;;  %v539_v33 = vsub.f32 0.0, %v507_v35  ;;  %1240 = vlog2.f32 %v738_v48  ;;  %vm1866_vm2 = vcmp.lt.f32.partialorder %v735_v3, 0.0004427343  ;;  %vm452_vm12 = vcmp.ne.f32.partialorder %v1811_v12, %v1811_v12 }
  0xfa   :  { %v394_v47 = vpop.f32.mrf.mxu3  ;;  %v594_v31 = vmul.f32 1.442695, %v548_v43  ;;  %v1844_v55 = vadd.f32 %v373_v27, %v1687_v37  ;;  %v1851_v25 = vpop.eup %1232  ;;  %v606_v27 = vmul.f32 1.442695, %v554_v30 }
  0xfb   :  { %v1847_v9 = vadd.f32 %v394_v47, %v1661_v20  ;;  %v328_v17 = vpop.f32.mrf.mxu0  ;;  %v355_v44 = vpop.f32.mrf.mxu1  ;;  %v742_v20 = vadd.f32 1.0, %v741_v49  ;;  %v747_v8 = vadd.f32 1.0, %v1851_v25  ;;  %v576_v48 = vmul.f32 1.442695, %v539_v33 }
  0xfc   :  { %2379 = vst [vmem:[#allocation21_spill] sm:$0xff] %v1844_v55  ;;  %v1854_v22 = vadd.f32 %v328_v17, %v1691_v39  ;;  %v1856_v29 = vpop.eup %1234  ;;  %v523_v37 = vand.u32 2147483647, %v1844_v55  ;;  %v1860_v43 = vadd.f32 %v355_v44, %v1651_v16  ;;  %1242 = vpow2.f32 %v594_v31 }
  0xfd   :  { %v1237_v13 = vpop.eup %1236  ;;  %1244 = vpow2.f32 %v618_v42  ;;  %v530_v39 = vand.u32 2147483647, %v1847_v9  ;;  %v620_v16 = vmul.f32 1.442695, %v561_v40  ;;  %v750_v58 = vmul.f32 -0.5, %v1851_v25 }
  0xfe   :  { %v508_v57 = vand.u32 2147483647, %v1854_v22  ;;  %v517_v35 = vand.u32 2147483647, %v1860_v43  ;;  %1246 = vpow2.f32 %v574_v53  ;;  %v555_v49 = vsub.f32 0.0, %v523_v37  ;;  %v1870_v44 = vpop.eup %1238 }
  0xff   :  { %1248 = vlog2.f32 %v747_v8  ;;  %v731_v31 = vmul.f32 0.6931472, %v1237_v13  ;;  %2382 = vst [vmem:[#allocation22_spill] sm:$0xff] %v1870_v44  ;;  %v1874_v3 = vmul.f32 %v1818_v26, %v742_v20  ;;  %v1241_v40 = vpop.eup %1240  ;;  %v562_v33 = vsub.f32 0.0, %v530_v39 }
 0x100   :  { %v540_v17 = vsub.f32 0.0, %v508_v57  ;;  %v549_v30 = vsub.f32 0.0, %v517_v35  ;;  %1250 = vpow2.f32 %v606_v27  ;;  %v608_v20 = vmul.f32 1.442695, %v555_v49 }
 0x101   :  { %v376_v42 = vpop.f32.mrf.mxu2  ;;  %1252 = vpow2.f32 %v620_v16  ;;  %v744_v55 = vand.u32 2147483647, %v1818_v26  ;;  %v740_v49 = vmul.f32 0.6931472, %v1241_v40  ;;  %v622_v26 = vmul.f32 1.442695, %v562_v33 }
 0x102   :  { %v397_v1 = vpop.f32.mrf.mxu3  ;;  %v596_v37 = vmul.f32 1.442695, %v549_v30  ;;  %v1881_v13 = vadd.f32 %v376_v42, %v1685_v36  ;;  %v1886_v8 = vpop.eup %1242  ;;  %1254 = vpow2.f32 %v576_v48  ;;  %v578_v39 = vmul.f32 1.442695, %v540_v17 }
 0x103   :  { %v1884_v27 = vadd.f32 %v397_v1, %v1663_v21  ;;  %v331_v57 = vpop.f32.mrf.mxu0  ;;  %v1892_v53 = vpop.eup %1244  ;;  %v756_v36 = vadd.f32 1.0, %v1886_v8  ;;  %v737_v21 = vsel %vm1866_vm2, %v1838_v11, %v731_v31  ;;  %v751_v48 = vadd.f32 1.0, %v750_v58 }
 0x104   :  { %2383 = vst [vmem:[#allocation23_spill] sm:$0xff] %v1881_v13  ;;  %v1889_v35 = vadd.f32 %v331_v57, %v1689_v38  ;;  %v1898_v1 = vpop.eup %1246  ;;  %1256 = vpow2.f32 %v596_v37  ;;  %v524_v16 = vand.u32 2147483647, %v1881_v13  ;;  %v759_v11 = vmul.f32 -0.5, %v1886_v8 }
 0x105   :  { %v1249_v30 = vpop.eup %1248  ;;  %v531_v42 = vand.u32 2147483647, %v1884_v27  ;;  %1258 = vlog2.f32 %v756_v36  ;;  %v753_v47 = vand.u32 2147483647, %v1851_v25  ;;  %vm1912_vm5 = vcmp.lt.f32.partialorder %v744_v55, 0.0004427343 }
 0x106   :  { %v509_v38 = vand.u32 2147483647, %v1889_v35  ;;  %v1903_v17 = vpop.eup %1250  ;;  %1260 = vpow2.f32 %v608_v20  ;;  %v2387_v58 = vmax.f32 %v1724_v15, 0.0  ;;  %v556_v20 = vsub.f32 0.0, %v524_v16 }
 0x107   :  { %2384 = vst [vmem:[#allocation24_spill] sm:$0xff] %v1903_v17  ;;  %1262 = vpow2.f32 %v578_v39  ;;  %v1918_v37 = vpop.eup %1252  ;;  %v749_v44 = vmul.f32 0.6931472, %v1249_v30  ;;  %v746_v17 = vsel %vm1912_vm5, %v1874_v3, %v740_v49  ;;  %v563_v39 = vsub.f32 0.0, %v531_v42 }
 0x108   :  { %v541_v57 = vsub.f32 0.0, %v509_v38  ;;  %v929_v33 = vadd.f32 %v737_v21, %v2387_v58  ;;  %v1927_v55 = vpop.eup %1254  ;;  %1264 = vpow2.f32 %v622_v26  ;;  %v752_v30 = vmul.f32 %v1851_v25, %v751_v48 }
 0x109   :  { %v760_v3 = vadd.f32 1.0, %v759_v11  ;;  %v762_v49 = vand.u32 2147483647, %v1886_v8  ;;  %vm1937_vm8 = vcmp.lt.f32.partialorder %v753_v47, 0.0004427343  ;;  %v2390_v25 = vmax.f32 %v1742_v4, 0.0 }
 0x10a   :  { %v580_v36 = vmul.f32 1.442695, %v541_v57  ;;  %v400_v38 = vpop.f32.mrf.mxu3  ;;  %v1257_v57 = vpop.eup %1256  ;;  %v610_v48 = vmul.f32 1.442695, %v556_v20  ;;  %v421_v13 = vmax.f32 %v1860_v43, 0.0  ;;  %vm453_vm11 = vcmp.ne.f32.partialorder %v1860_v43, %v1860_v43 }
 0x10b   :  { %v1930_v21 = vadd.f32 %v400_v38, %v1668_v23  ;;  %v334_v16 = vpop.f32.mrf.mxu0  ;;  %v1259_v31 = vpop.eup %1258  ;;  %v765_v23 = vadd.f32 1.0, %v1257_v57  ;;  %v930_v42 = vadd.f32 %v746_v17, %v2390_v25  ;;  %v768_v47 = vmul.f32 -0.5, %v1257_v57 }
 0x10c   :  { %v1934_v40 = vadd.f32 %v334_v16, %v1683_v34  ;;  %1266 = vpow2.f32 %v580_v36  ;;  %v1946_v34 = vpop.eup %1260  ;;  %v755_v38 = vsel %vm1937_vm8, %v752_v30, %v749_v44  ;;  %v624_v36 = vmul.f32 1.442695, %v563_v39 }
 0x10d   :  { %v532_v26 = vand.u32 2147483647, %v1930_v21  ;;  %2391 = vst [vmem:[#allocation25_spill] sm:$0xff] %v1946_v34  ;;  %v1951_v16 = vpop.eup %1262  ;;  %1268 = vlog2.f32 %v765_v23  ;;  %v2393_v17 = vsel %vm1823_vm1, %v1814_v41, %v1849_v51  ;;  %v758_v14 = vmul.f32 0.6931472, %v1259_v31 }
 0x10e   :  { %v510_v11 = vand.u32 2147483647, %v1934_v40  ;;  %v928_v20 = vadd.f32 %v2393_v17, %v2392_v59  ;;  %vm1961_vm10 = vcmp.lt.f32.partialorder %v762_v49, 0.0004427343  ;;  %v1965_v44 = vpop.eup %1264  ;;  %v761_v39 = vmul.f32 %v1886_v8, %v760_v3 }
 0x10f   :  { %v564_v25 = vsub.f32 0.0, %v532_v26  ;;  %v2396_v30 = vmax.f32 %v1772_v2, 0.0  ;;  %v1974_v41 = vsel %vm450_vm3, %v1742_v4, %v930_v42  ;;  %v1980_v59 = vsel %vm449_vm4, %v1724_v15, %v929_v33 }
 0x110   :  { %v542_v34 = vsub.f32 0.0, %v510_v11  ;;  %1270 = vpow2.f32 %v610_v48  ;;  %v769_v8 = vadd.f32 1.0, %v768_v47  ;;  %v684_v31 = vadd.f32 1.0, %v1951_v16 }
 0x111   :  { %v931_v23 = vadd.f32 %v755_v38, %v2396_v30  ;;  %1272 = vpow2.f32 %v624_v36  ;;  %v771_v49 = vand.u32 2147483647, %v1257_v57  ;;  %v1996_v15 = vsel %vm448_vm6, %v1708_v60, %v928_v20 }
 0x112   :  { %v582_v46 = vmul.f32 1.442695, %v542_v34  ;;  %v403_v51 = vpop.f32.mrf.mxu3  ;;  %v1985_v3 = vpop.eup %1266  ;;  %v626_v33 = vmul.f32 1.442695, %v564_v25  ;;  %v764_v26 = vsel %vm1961_vm10, %v761_v39, %v758_v14  ;;  %v2007_v48 = vsel %vm447_vm7, %v1703_v50, %v1835_v19 }
 0x113   :  { %v1988_v4 = vadd.f32 %v403_v51, %v1656_v18  ;;  %v693_v42 = vadd.f32 1.0, %v1985_v3  ;;  %v1269_v34 = vpop.eup %1268  ;;  %v687_v60 = vmul.f32 -0.5, %v1951_v16  ;;  %v770_v47 = vmul.f32 %v1257_v57, %v769_v8 }
 0x114   :  { %1274 = vpow2.f32 %v582_v46  ;;  %v767_v11 = vmul.f32 0.6931472, %v1269_v34  ;;  %v963_v14 = vsel %vm451_vm9, %v1772_v2, %v931_v23  ;;  %vm772_vm13 = vcmp.lt.f32.partialorder %v771_v49, 0.0004427343 }
 0x115   :  { %v533_v18 = vand.u32 2147483647, %v1988_v4  ;;  %1276 = vlog2.f32 %v684_v31  ;;  %v2397_v36 = vmax.f32 %v1811_v12, 0.0  ;;  %v413_v20 = vmax.f32 %v1889_v35, 0.0 }
 0x116   :  { %1278 = vlog2.f32 %v693_v42  ;;  %v2017_v50 = vpop.eup %1270  ;;  %v773_v19 = vsel %vm772_vm13, %v770_v47, %v767_v11  ;;  %v696_v25 = vmul.f32 -0.5, %v1985_v3  ;;  %v675_v57 = vadd.f32 1.0, %v1927_v55 }
 0x117   :  { %v565_v38 = vsub.f32 0.0, %v533_v18  ;;  %v932_v17 = vadd.f32 %v764_v26, %v2397_v36  ;;  %1280 = vpow2.f32 %v626_v33  ;;  %v2021_v58 = vpop.eup %1272  ;;  %v933_v2 = vadd.f32 %v773_v19, %v421_v13 }
 0x118   :  { %v688_v30 = vadd.f32 1.0, %v687_v60  ;;  %v678_v23 = vmul.f32 -0.5, %v1927_v55  ;;  %v414_v51 = vmax.f32 %v1934_v40, 0.0  ;;  %v699_v8 = vand.u32 2147483647, %v1985_v3 }
 0x119   :  { %v628_v39 = vmul.f32 1.442695, %v565_v38  ;;  %v690_v31 = vand.u32 2147483647, %v1951_v16  ;;  %1282 = vlog2.f32 %v675_v57  ;;  %v965_v33 = vsel %vm453_vm11, %v1860_v43, %v933_v2 }
 0x11a   :  { %v1275_v46 = vpop.eup %1274  ;;  %998 = vmatpush.msrb.mxu1 %v965_v33  ;;  %v964_v34 = vsel %vm452_vm12, %v1811_v12, %v932_v17  ;;  %v697_v18 = vadd.f32 1.0, %v696_v25  ;;  %v412_v60 = vmax.f32 %v1854_v22, 0.0  ;;  %v689_v47 = vmul.f32 %v1951_v16, %v688_v30 }
 0x11b   :  { %v1277_v49 = vpop.eup %1276  ;;  %1284 = vpow2.f32 %v628_v39  ;;  %v702_v26 = vadd.f32 1.0, %v1275_v46  ;;  %v705_v13 = vmul.f32 -0.5, %v1275_v46  ;;  %v679_v38 = vadd.f32 1.0, %v678_v23 }
 0x11c   :  { %v1279_v42 = vpop.eup %1278  ;;  %v686_v11 = vmul.f32 0.6931472, %v1277_v49  ;;  %v681_v36 = vand.u32 2147483647, %v1927_v55  ;;  %999 = vmatpush.msrb.mxu1 %v964_v34  ;;  %vm444_vm14 = vcmp.ne.f32.partialorder %v1854_v22, %v1854_v22  ;;  %vm2042_vm15 = vcmp.lt.f32.partialorder %v690_v31, 0.0004427343 }
 0x11d   :  { %1286 = vlog2.f32 %v702_v26  ;;  %v2038_v43 = vpop.eup %1280  ;;  %v695_v19 = vmul.f32 0.6931472, %v1279_v42  ;;  %v666_v12 = vadd.f32 1.0, %v1898_v1  ;;  %v706_v17 = vadd.f32 1.0, %v705_v13 }
 0x11e   :  { %vm2047_vm0 = vcmp.lt.f32.partialorder %v699_v8, 0.0004427343  ;;  %v692_v16 = vsel %vm2042_vm15, %v689_v47, %v686_v11  ;;  %v411_v39 = vmax.f32 %v1805_v5, 0.0  ;;  %1000 = vmatpush.msrb.mxu1 %v963_v14  ;;  %vm446_vm1 = vcmp.ne.f32.partialorder %v1934_v40, %v1934_v40 }
 0x11f   :  { %v1283_v2 = vpop.eup %1282  ;;  %vm445_vm2 = vcmp.ne.f32.partialorder %v1889_v35, %v1889_v35  ;;  %v698_v30 = vmul.f32 %v1985_v3, %v697_v18  ;;  %v437_v23 = vmax.f32 %v1988_v4, 0.0  ;;  %1288 = vlog2.f32 %v666_v12 }
 0x120   :  { %v669_v8 = vmul.f32 -0.5, %v1898_v1  ;;  %v708_v49 = vand.u32 2147483647, %v1275_v46  ;;  %v680_v33 = vmul.f32 %v1927_v55, %v679_v38  ;;  %vm2062_vm3 = vcmp.lt.f32.partialorder %v681_v36, 0.0004427343  ;;  %1001 = vmatpush.msrb.mxu1 %v1974_v41 }
 0x121   :  { %v1285_v31 = vpop.eup %1284  ;;  %v410_v14 = vmax.f32 %v1779_v28, 0.0  ;;  %v701_v3 = vsel %vm2047_vm0, %v698_v30, %v695_v19  ;;  %v924_v13 = vadd.f32 %v692_v16, %v412_v60  ;;  %v672_v34 = vand.u32 2147483647, %v1898_v1 }
 0x122   :  { %v909_v42 = vadd.f32 1.0, %v1285_v31  ;;  %v707_v11 = vmul.f32 %v1275_v46, %v706_v17  ;;  %v677_v47 = vmul.f32 0.6931472, %v1283_v2  ;;  %v912_v57 = vmul.f32 -0.5, %v1285_v31  ;;  %1002 = vmatpush.msrb.mxu1 %v1980_v59 }
 0x123   :  { %v1287_v18 = vpop.eup %1286  ;;  %v900_v55 = vadd.f32 1.0, %v2038_v43  ;;  %v670_v36 = vadd.f32 1.0, %v669_v8  ;;  %v903_v41 = vmul.f32 -0.5, %v2038_v43  ;;  %vm709_vm4 = vcmp.lt.f32.partialorder %v708_v49, 0.0004427343 }
 0x124   :  { %v704_v38 = vmul.f32 0.6931472, %v1287_v18  ;;  %1290 = vlog2.f32 %v909_v42  ;;  %v925_v60 = vadd.f32 %v701_v3, %v413_v20  ;;  %vm443_vm5 = vcmp.ne.f32.partialorder %v1805_v5, %v1805_v5  ;;  %1003 = vmatpush.msrb.mxu1 %v1996_v15 }
 0x125   :  { %v436_v46 = vmax.f32 %v1930_v21, 0.0  ;;  %1292 = vlog2.f32 %v900_v55  ;;  %v1289_v19 = vpop.eup %1288  ;;  %v956_v59 = vsel %vm444_vm14, %v1854_v22, %v924_v13  ;;  %v915_v17 = vand.u32 2147483647, %v1285_v31 }
 0x126   :  { %v710_v12 = vsel %vm709_vm4, %v707_v11, %v704_v38  ;;  %vm2084_vm6 = vcmp.lt.f32.partialorder %v672_v34, 0.0004427343  ;;  %v683_v16 = vsel %vm2062_vm3, %v680_v33, %v677_v47  ;;  %vm469_vm7 = vcmp.ne.f32.partialorder %v1988_v4, %v1988_v4  ;;  %1004 = vmatpush.msrb.mxu1 %v2007_v48 }
 0x127   :  { %v926_v20 = vadd.f32 %v710_v12, %v414_v51  ;;  %v913_v15 = vadd.f32 1.0, %v912_v57  ;;  %v668_v2 = vmul.f32 0.6931472, %v1289_v19  ;;  %vm442_vm8 = vcmp.ne.f32.partialorder %v1779_v28, %v1779_v28 }
 0x128   :  { %v671_v22 = vmul.f32 %v1898_v1, %v670_v36  ;;  %v904_v30 = vadd.f32 1.0, %v903_v41  ;;  %v906_v8 = vand.u32 2147483647, %v2038_v43  ;;  %v657_v51 = vadd.f32 1.0, %v1856_v29 }
 0x129   :  { %v958_v49 = vsel %vm446_vm1, %v1934_v40, %v926_v20  ;;  %v957_v48 = vsel %vm445_vm2, %v1889_v35, %v925_v60  ;;  %vm468_vm9 = vcmp.ne.f32.partialorder %v1930_v21, %v1930_v21  ;;  %v660_v1 = vmul.f32 -0.5, %v1856_v29 }
 0x12a   :  { %v1291_v33 = vpop.eup %1290  ;;  %1005 = vmatpush.msrb.mxu1 %v958_v49  ;;  %v923_v26 = vadd.f32 %v683_v16, %v411_v39  ;;  %vm2111_vm10 = vcmp.lt.f32.partialorder %v915_v17, 0.0004427343  ;;  %v674_v40 = vsel %vm2084_vm6, %v671_v22, %v668_v2  ;;  %1294 = vlog2.f32 %v657_v51 }
 0x12b   :  { %v1293_v13 = vpop.eup %1292  ;;  %v911_v42 = vmul.f32 0.6931472, %v1291_v33  ;;  %v914_v34 = vmul.f32 %v1285_v31, %v913_v15  ;;  %v663_v35 = vand.u32 2147483647, %v1856_v29  ;;  %v891_v18 = vadd.f32 1.0, %v2021_v58 }
 0x12c   :  { %1006 = vmatpush.msrb.mxu1 %v957_v48  ;;  %v902_v11 = vmul.f32 0.6931472, %v1293_v13  ;;  %v905_v47 = vmul.f32 %v2038_v43, %v904_v30  ;;  %vm907_vm11 = vcmp.lt.f32.partialorder %v906_v8, 0.0004427343  ;;  %v894_v39 = vmul.f32 -0.5, %v2021_v58 }
 0x12d   :  { %v917_v57 = vsel %vm2111_vm10, %v914_v34, %v911_v42  ;;  %v922_v55 = vadd.f32 %v674_v40, %v410_v14  ;;  %v661_v38 = vadd.f32 1.0, %v660_v1  ;;  %1296 = vlog2.f32 %v891_v18 }
 0x12e   :  { %1007 = vmatpush.msrb.mxu1 %v956_v59  ;;  %v955_v31 = vsel %vm443_vm5, %v1805_v5, %v923_v26  ;;  %v949_v36 = vadd.f32 %v917_v57, %v437_v23  ;;  %v908_v41 = vsel %vm907_vm11, %v905_v47, %v902_v11  ;;  %v648_v43 = vadd.f32 1.0, %v1808_v7 }
 0x12f   :  { %v948_v60 = vadd.f32 %v908_v41, %v436_v46  ;;  %v409_v19 = vmax.f32 %v1745_v6, 0.0  ;;  %vm2131_vm12 = vcmp.lt.f32.partialorder %v663_v35, 0.0004427343  ;;  %v651_v14 = vmul.f32 -0.5, %v1808_v7 }
 0x130   :  { %v1295_v59 = vpop.eup %1294  ;;  %1008 = vmatpush.msrb.mxu1 %v955_v31  ;;  %v981_v5 = vsel %vm469_vm7, %v1988_v4, %v949_v36  ;;  %v895_v23 = vadd.f32 1.0, %v894_v39  ;;  %v897_v17 = vand.u32 2147483647, %v2021_v58  ;;  %1298 = vlog2.f32 %v648_v43 }
 0x131   :  { %1021 = vmatpush.msrb.mxu2 %v981_v5  ;;  %v954_v46 = vsel %vm442_vm8, %v1779_v28, %v922_v55  ;;  %v659_v25 = vmul.f32 0.6931472, %v1295_v59  ;;  %v662_v20 = vmul.f32 %v1856_v29, %v661_v38  ;;  %v652_v16 = vadd.f32 1.0, %v651_v14 }
 0x132   :  { %1009 = vmatpush.msrb.mxu1 %v954_v46  ;;  %v980_v4 = vsel %vm468_vm9, %v1930_v21, %v948_v60  ;;  %v654_v15 = vand.u32 2147483647, %v1808_v7  ;;  %v882_v2 = vadd.f32 1.0, %v1965_v44  ;;  %v885_v22 = vmul.f32 -0.5, %v1965_v44 }
 0x133   :  { %v1297_v30 = vpop.eup %1296  ;;  %1022 = vmatpush.msrb.mxu2 %v980_v4  ;;  %vm441_vm13 = vcmp.ne.f32.partialorder %v1745_v6, %v1745_v6  ;;  %v665_v29 = vsel %vm2131_vm12, %v662_v20, %v659_v25  ;;  %v435_v28 = vmax.f32 %v1884_v27, 0.0  ;;  %v639_v8 = vadd.f32 1.0, %v1769_v0 }
 0x134   :  { %v921_v51 = vadd.f32 %v665_v29, %v409_v19  ;;  %v893_v21 = vmul.f32 0.6931472, %v1297_v30  ;;  %v896_v49 = vmul.f32 %v2021_v58, %v895_v23  ;;  %1300 = vlog2.f32 %v882_v2 }
 0x135   :  { %vm898_vm14 = vcmp.lt.f32.partialorder %v897_v17, 0.0004427343  ;;  %v653_v48 = vmul.f32 %v1808_v7, %v652_v16  ;;  %1302 = vlog2.f32 %v639_v8  ;;  %v642_v1 = vmul.f32 -0.5, %v1769_v0 }
 0x136   :  { %v1299_v33 = vpop.eup %1298  ;;  %v953_v26 = vsel %vm441_vm13, %v1745_v6, %v921_v51  ;;  %v899_v3 = vsel %vm898_vm14, %v896_v49, %v893_v21  ;;  %vm2163_vm15 = vcmp.lt.f32.partialorder %v654_v15, 0.0004427343  ;;  %v886_v13 = vadd.f32 1.0, %v885_v22 }
 0x137   :  { %1010 = vmatpush.msrb.mxu1 %v953_v26  ;;  %v947_v42 = vadd.f32 %v899_v3, %v435_v28  ;;  %v650_v34 = vmul.f32 0.6931472, %v1299_v33  ;;  %v643_v58 = vadd.f32 1.0, %v642_v1  ;;  %v645_v35 = vand.u32 2147483647, %v1769_v0 }
 0x138   :  { %vm467_vm0 = vcmp.ne.f32.partialorder %v1884_v27, %v1884_v27  ;;  %v408_v7 = vmax.f32 %v1727_v24, 0.0  ;;  %v888_v18 = vand.u32 2147483647, %v1965_v44  ;;  %v873_v6 = vadd.f32 1.0, %v1918_v37 }
 0x139   :  { %v979_v11 = vsel %vm467_vm0, %v1884_v27, %v947_v42  ;;  %vm440_vm1 = vcmp.ne.f32.partialorder %v1727_v24, %v1727_v24  ;;  %v656_v47 = vsel %vm2163_vm15, %v653_v48, %v650_v34  ;;  %v876_v39 = vmul.f32 -0.5, %v1918_v37  ;;  %v2416_v27 = vld [vmem:[#allocation14_spill] sm:$0xff] }
 0x13a   :  { %v1301_v57 = vpop.eup %1300  ;;  %1023 = vmatpush.msrb.mxu2 %v979_v11  ;;  %v920_v55 = vadd.f32 %v656_v47, %v408_v7  ;;  %v887_v38 = vmul.f32 %v1965_v44, %v886_v13  ;;  %v644_v31 = vmul.f32 %v1769_v0, %v643_v58  ;;  %1304 = vlog2.f32 %v873_v6  ;;  %v982_v6 = vld [vmem:[#allocation5] sm:$0xff] }
 0x13b   :  { %v1303_v36 = vpop.eup %1302  ;;  %v884_v41 = vmul.f32 0.6931472, %v1301_v57  ;;  %vm2181_vm2 = vcmp.lt.f32.partialorder %v645_v35, 0.0004427343  ;;  %v630_v43 = vadd.f32 1.0, %v1766_v54  ;;  %v633_v60 = vmul.f32 -0.5, %v1766_v54 }
 0x13c   :  { %v952_v19 = vsel %vm440_vm1, %v1727_v24, %v920_v55  ;;  %v434_v12 = vmax.f32 %v1847_v9, 0.0  ;;  %vm889_vm3 = vcmp.lt.f32.partialorder %v888_v18, 0.0004427343  ;;  %v641_v14 = vmul.f32 0.6931472, %v1303_v36 }
 0x13d   :  { %1011 = vmatpush.msrb.mxu1 %v952_v19  ;;  %v890_v44 = vsel %vm889_vm3, %v887_v38, %v884_v41  ;;  %v407_v0 = vmax.f32 %v1712_v62, 0.0  ;;  %v877_v59 = vadd.f32 1.0, %v876_v39  ;;  %1306 = vlog2.f32 %v630_v43 }
 0x13e   :  { %v946_v5 = vadd.f32 %v890_v44, %v434_v12  ;;  %v647_v23 = vsel %vm2181_vm2, %v644_v31, %v641_v14  ;;  %v879_v17 = vand.u32 2147483647, %v1918_v37  ;;  %v634_v46 = vadd.f32 1.0, %v633_v60 }
 0x13f   :  { %vm466_vm4 = vcmp.ne.f32.partialorder %v1847_v9, %v1847_v9  ;;  %v919_v24 = vadd.f32 %v647_v23, %v407_v0  ;;  %v636_v25 = vand.u32 2147483647, %v1766_v54  ;;  %v864_v20 = vadd.f32 1.0, %v1892_v53  ;;  %v2417_v23 = vld [vmem:[#allocation11_spill] sm:$0xff] }
 0x140   :  { %v1305_v16 = vpop.eup %1304  ;;  %v978_v4 = vsel %vm466_vm4, %v1847_v9, %v946_v5  ;;  %vm439_vm5 = vcmp.ne.f32.partialorder %v1712_v62, %v1712_v62  ;;  %v433_v15 = vmax.f32 %v1802_v63, 0.0  ;;  %v867_v2 = vmul.f32 -0.5, %v1892_v53 }
 0x141   :  { %1024 = vmatpush.msrb.mxu2 %v978_v4  ;;  %v951_v22 = vsel %vm439_vm5, %v1712_v62, %v919_v24  ;;  %v875_v30 = vmul.f32 0.6931472, %v1305_v16  ;;  %v878_v29 = vmul.f32 %v1918_v37, %v877_v59  ;;  %1308 = vlog2.f32 %v864_v20  ;;  %v2418_v24 = vld [vmem:[#allocation25_spill] sm:$0xff] }
 0x142   :  { %1012 = vmatpush.msrb.mxu1 %v951_v22  ;;  %vm465_vm6 = vcmp.ne.f32.partialorder %v1802_v63, %v1802_v63  ;;  %vm880_vm7 = vcmp.lt.f32.partialorder %v879_v17, 0.0004427343  ;;  %v635_v9 = vmul.f32 %v1766_v54, %v634_v46  ;;  %v855_v28 = vadd.f32 1.0, %v1841_v10 }
 0x143   :  { %v1307_v8 = vpop.eup %1306  ;;  %v881_v51 = vsel %vm880_vm7, %v878_v29, %v875_v30  ;;  %v406_v21 = vmax.f32 %v1710_v61, 0.0  ;;  %vm2209_vm8 = vcmp.lt.f32.partialorder %v636_v25, 0.0004427343  ;;  %v858_v62 = vmul.f32 -0.5, %v1841_v10  ;;  %v2419_v29 = vld [vmem:[#allocation23_spill] sm:$0xff] }
 0x144   :  { %v945_v37 = vadd.f32 %v881_v51, %v433_v15  ;;  %v632_v48 = vmul.f32 0.6931472, %v1307_v8  ;;  %v868_v1 = vadd.f32 1.0, %v867_v2  ;;  %1310 = vlog2.f32 %v855_v28  ;;  %v984_v15 = vld [vmem:[#allocation5 + $0x10] sm:$0xff]  ;;  %v2420_v28 = vld [vmem:[#allocation24_spill] sm:$0xff] }
 0x145   :  { %vm438_vm9 = vcmp.ne.f32.partialorder %v1710_v61, %v1710_v61  ;;  %v432_v54 = vmax.f32 %v1764_v52, 0.0  ;;  %v870_v33 = vand.u32 2147483647, %v1892_v53  ;;  %v846_v26 = vadd.f32 1.0, %v1796_v45 }
 0x146   :  { %v977_v3 = vsel %vm465_vm6, %v1802_v63, %v945_v37  ;;  %v638_v40 = vsel %vm2209_vm8, %v635_v9, %v632_v48  ;;  %vm464_vm10 = vcmp.ne.f32.partialorder %v1764_v52, %v1764_v52  ;;  %v849_v13 = vmul.f32 -0.5, %v1796_v45 }
 0x147   :  { %v1309_v42 = vpop.eup %1308  ;;  %1025 = vmatpush.msrb.mxu2 %v977_v3  ;;  %v918_v34 = vadd.f32 %v638_v40, %v406_v21  ;;  %v859_v58 = vadd.f32 1.0, %v858_v62  ;;  %v861_v35 = vand.u32 2147483647, %v1841_v10  ;;  %1312 = vlog2.f32 %v846_v26  ;;  %v2422_v40 = vld [vmem:[#allocation21_spill] sm:$0xff] }
 0x148   :  { %v866_v7 = vmul.f32 0.6931472, %v1309_v42  ;;  %v869_v18 = vmul.f32 %v1892_v53, %v868_v1  ;;  %v837_v63 = vadd.f32 1.0, %v1758_v32  ;;  %v840_v11 = vmul.f32 -0.5, %v1758_v32 }
 0x149   :  { %v950_v47 = vsel %vm438_vm9, %v1710_v61, %v918_v34  ;;  %vm871_vm11 = vcmp.lt.f32.partialorder %v870_v33, 0.0004427343  ;;  %v431_v39 = vmax.f32 %v1738_v56, 0.0  ;;  %vm463_vm12 = vcmp.ne.f32.partialorder %v1738_v56, %v1738_v56 }
 0x14a   :  { %v1311_v57 = vpop.eup %1310  ;;  %1013 = vmatpush.msrb.mxu1 %v950_v47  ;;  %v872_v55 = vsel %vm871_vm11, %v869_v18, %v866_v7  ;;  %v850_v53 = vadd.f32 1.0, %v849_v13  ;;  %v852_v38 = vand.u32 2147483647, %v1796_v45  ;;  %1314 = vlog2.f32 %v837_v63 }
 0x14b   :  { %v944_v31 = vadd.f32 %v872_v55, %v432_v54  ;;  %1014 = vmatmul.f32.vlgmr.msrb.gmra.mxu1 %v982_v6  ;;  %v857_v36 = vmul.f32 0.6931472, %v1311_v57  ;;  %v860_v41 = vmul.f32 %v1841_v10, %v859_v58  ;;  %v828_v61 = vadd.f32 1.0, %v2017_v50  ;;  %v2421_v54 = vld [vmem:[#allocation22_spill] sm:$0xff]  ;;  %v2423_v6 = vld [vmem:[#allocation20_spill] sm:$0xff] }
 0x14c   :  { %vm862_vm13 = vcmp.lt.f32.partialorder %v861_v35, 0.0004427343  ;;  %v430_v43 = vmax.f32 %v2416_v27, 0.0  ;;  %v841_v60 = vadd.f32 1.0, %v840_v11  ;;  %v831_v19 = vmul.f32 -0.5, %v2017_v50 }
 0x14d   :  { %v1313_v12 = vpop.eup %1312  ;;  %v976_v14 = vsel %vm464_vm10, %v1764_v52, %v944_v31  ;;  %v863_v44 = vsel %vm862_vm13, %v860_v41, %v857_v36  ;;  %vm462_vm14 = vcmp.ne.f32.partialorder %v2416_v27, %v2416_v27  ;;  %1316 = vlog2.f32 %v828_v61 }
 0x14e   :  { %1026 = vmatpush.msrb.mxu2 %v976_v14  ;;  %v943_v10 = vadd.f32 %v863_v44, %v431_v39  ;;  %v848_v0 = vmul.f32 0.6931472, %v1313_v12  ;;  %v851_v59 = vmul.f32 %v1796_v45, %v850_v53  ;;  %v843_v5 = vand.u32 2147483647, %v1758_v32  ;;  %v2424_v53 = vld [vmem:[#allocation19_spill] sm:$0xff] }
 0x14f   :  { %vm853_vm15 = vcmp.lt.f32.partialorder %v852_v38, 0.0004427343  ;;  %v429_v17 = vmax.f32 %v2417_v23, 0.0  ;;  %v832_v46 = vadd.f32 1.0, %v831_v19  ;;  %v819_v25 = vadd.f32 1.0, %v2418_v24 }
 0x150   :  { %v1315_v20 = vpop.eup %1314  ;;  %v975_v52 = vsel %vm463_vm12, %v1738_v56, %v943_v10  ;;  %v854_v16 = vsel %vm853_vm15, %v851_v59, %v848_v0  ;;  %v842_v4 = vmul.f32 %v1758_v32, %v841_v60  ;;  %v822_v45 = vmul.f32 -0.5, %v2418_v24  ;;  %v2426_v60 = vld [vmem:[#allocation18_spill] sm:$0xff] }
 0x151   :  { %1027 = vmatpush.msrb.mxu2 %v975_v52  ;;  %v942_v2 = vadd.f32 %v854_v16, %v430_v43  ;;  %v839_v22 = vmul.f32 0.6931472, %v1315_v20  ;;  %v834_v30 = vand.u32 2147483647, %v2017_v50  ;;  %1318 = vlog2.f32 %v819_v25 }
 0x152   :  { %vm461_vm0 = vcmp.ne.f32.partialorder %v2417_v23, %v2417_v23  ;;  %vm844_vm1 = vcmp.lt.f32.partialorder %v843_v5, 0.0004427343  ;;  %v428_v9 = vmax.f32 %v2419_v29, 0.0  ;;  %v810_v56 = vadd.f32 1.0, %v2420_v28 }
 0x153   :  { %v1317_v8 = vpop.eup %1316  ;;  %v974_v32 = vsel %vm462_vm14, %v2416_v27, %v942_v2  ;;  %v845_v51 = vsel %vm844_vm1, %v842_v4, %v839_v22  ;;  %v833_v21 = vmul.f32 %v2017_v50, %v832_v46  ;;  %1017 = vmatmul.f32.gmra.mxu1 %v984_v15  ;;  %v813_v49 = vmul.f32 -0.5, %v2420_v28  ;;  %v2425_v27 = vld [vmem:[#allocation16_spill] sm:$0xff] }
 0x154   :  { %1028 = vmatpush.msrb.mxu2 %v974_v32  ;;  %v941_v62 = vadd.f32 %v845_v51, %v429_v17  ;;  %v830_v37 = vmul.f32 0.6931472, %v1317_v8  ;;  %v823_v48 = vadd.f32 1.0, %v822_v45  ;;  %1320 = vlog2.f32 %v810_v56 }
 0x155   :  { %vm835_vm2 = vcmp.lt.f32.partialorder %v834_v30, 0.0004427343  ;;  %v825_v1 = vand.u32 2147483647, %v2418_v24  ;;  %v801_v33 = vadd.f32 1.0, %v2421_v54  ;;  %v804_v26 = vmul.f32 -0.5, %v2421_v54 }
 0x156   :  { %v973_v50 = vsel %vm461_vm0, %v2417_v23, %v941_v62  ;;  %vm460_vm3 = vcmp.ne.f32.partialorder %v2419_v29, %v2419_v29  ;;  %v836_v3 = vsel %vm835_vm2, %v833_v21, %v830_v37  ;;  %v427_v13 = vmax.f32 %v2422_v40, 0.0  ;;  %v2428_v30 = vld [vmem:[#allocation15_spill] sm:$0xff]  ;;  %v2429_v37 = vld [vmem:[#allocation13_spill] sm:$0xff] }
 0x157   :  { %v1319_v42 = vpop.eup %1318  ;;  %1029 = vmatpush.msrb.mxu2 %v973_v50  ;;  %v940_v34 = vadd.f32 %v836_v3, %v428_v9  ;;  %vm459_vm4 = vcmp.ne.f32.partialorder %v2422_v40, %v2422_v40  ;;  %v814_v58 = vadd.f32 1.0, %v813_v49  ;;  %1322 = vlog2.f32 %v801_v33 }
 0x158   :  { %v821_v35 = vmul.f32 0.6931472, %v1319_v42  ;;  %v824_v7 = vmul.f32 %v2418_v24, %v823_v48  ;;  %v816_v18 = vand.u32 2147483647, %v2420_v28  ;;  %v792_v63 = vadd.f32 1.0, %v2423_v6  ;;  %v2427_v24 = vld [vmem:[#allocation17_spill] sm:$0xff] }
 0x159   :  { %v972_v11 = vsel %vm460_vm3, %v2419_v29, %v940_v34  ;;  %vm826_vm5 = vcmp.lt.f32.partialorder %v825_v1, 0.0004427343  ;;  %v805_v47 = vadd.f32 1.0, %v804_v26  ;;  %v795_v39 = vmul.f32 -0.5, %v2423_v6  ;;  %v2430_v26 = vld [vmem:[#allocation12_spill] sm:$0xff] }
 0x15a   :  { %v1321_v57 = vpop.eup %1320  ;;  %1030 = vmatpush.msrb.mxu2 %v972_v11  ;;  %v827_v55 = vsel %vm826_vm5, %v824_v7, %v821_v35  ;;  %v426_v38 = vmax.f32 %v2424_v53, 0.0  ;;  %vm458_vm6 = vcmp.ne.f32.partialorder %v2424_v53, %v2424_v53  ;;  %1324 = vlog2.f32 %v792_v63  ;;  %v985_v7 = vld [vmem:[#allocation5 + $0x18] sm:$0xff] }
 0x15b   :  { %v939_v31 = vadd.f32 %v827_v55, %v427_v13  ;;  %v812_v36 = vmul.f32 0.6931472, %v1321_v57  ;;  %v815_v41 = vmul.f32 %v2420_v28, %v814_v58  ;;  %v807_v61 = vand.u32 2147483647, %v2421_v54  ;;  %v983_v58 = vld [vmem:[#allocation5 + $0x8] sm:$0xff]  ;;  %v996_v55 = vpop.permute.xlu0 %995 }
 0x15c   :  { %vm817_vm7 = vcmp.lt.f32.partialorder %v816_v18, 0.0004427343  ;;  %v425_v43 = vmax.f32 %v2425_v27, 0.0  ;;  %v783_v19 = vadd.f32 1.0, %v2426_v60  ;;  %v786_v12 = vmul.f32 -0.5, %v2426_v60 }
 0x15d   :  { %v1323_v14 = vpop.eup %1322  ;;  %v971_v44 = vsel %vm459_vm4, %v2422_v40, %v939_v31  ;;  %v818_v10 = vsel %vm817_vm7, %v815_v41, %v812_v36  ;;  %v806_v0 = vmul.f32 %v2421_v54, %v805_v47  ;;  %v796_v59 = vadd.f32 1.0, %v795_v39 }
 0x15e   :  { %1031 = vmatpush.msrb.mxu2 %v971_v44  ;;  %v938_v5 = vadd.f32 %v818_v10, %v426_v38  ;;  %v803_v23 = vmul.f32 0.6931472, %v1323_v14  ;;  %v798_v17 = vand.u32 2147483647, %v2423_v6  ;;  %1326 = vlog2.f32 %v783_v19 }
 0x15f   :  { %vm808_vm8 = vcmp.lt.f32.partialorder %v807_v61, 0.0004427343  ;;  %v787_v46 = vadd.f32 1.0, %v786_v12  ;;  %v774_v25 = vadd.f32 1.0, %v2427_v24  ;;  %v777_v20 = vmul.f32 -0.5, %v2427_v24 }
 0x160   :  { %v1325_v52 = vpop.eup %1324  ;;  %v970_v16 = vsel %vm458_vm6, %v2424_v53, %v938_v5  ;;  %v809_v4 = vsel %vm808_vm8, %v806_v0, %v803_v23  ;;  %v789_v15 = vand.u32 2147483647, %v2426_v60  ;;  %v797_v22 = vmul.f32 %v2423_v6, %v796_v59  ;;  %v991_v6 = vpop.permute.xlu2 %990 }
 0x161   :  { %1032 = vmatpush.msrb.mxu2 %v970_v16  ;;  %v937_v45 = vadd.f32 %v809_v4, %v425_v43  ;;  %v794_v2 = vmul.f32 0.6931472, %v1325_v52  ;;  %1328 = vlog2.f32 %v774_v25  ;;  %vm457_vm9 = vcmp.ne.f32.partialorder %v2425_v27, %v2425_v27 }
 0x162   :  { %v424_v29 = vmax.f32 %v2428_v30, 0.0  ;;  %vm799_vm10 = vcmp.lt.f32.partialorder %v798_v17, 0.0004427343  ;;  %v778_v9 = vadd.f32 1.0, %v777_v20  ;;  %v788_v8 = vmul.f32 %v2426_v60, %v787_v46 }
 0x163   :  { %v969_v28 = vsel %vm457_vm9, %v2425_v27, %v937_v45  ;;  %v800_v56 = vsel %vm799_vm10, %v797_v22, %v794_v2  ;;  %v780_v32 = vand.u32 2147483647, %v2427_v24  ;;  %vm790_vm11 = vcmp.lt.f32.partialorder %v789_v15, 0.0004427343 }
 0x164   :  { %v1327_v51 = vpop.eup %1326  ;;  %1033 = vmatpush.msrb.mxu2 %v969_v28  ;;  %v936_v21 = vadd.f32 %v800_v56, %v424_v29  ;;  %vm456_vm12 = vcmp.ne.f32.partialorder %v2428_v30, %v2428_v30  ;;  %v423_v48 = vmax.f32 %v2429_v37, 0.0  ;;  %v779_v1 = vmul.f32 %v2427_v24, %v778_v9 }
 0x165   :  { %v785_v49 = vmul.f32 0.6931472, %v1327_v51  ;;  %v422_v50 = vmax.f32 %v2430_v26, 0.0  ;;  %vm781_vm13 = vcmp.lt.f32.partialorder %v780_v32, 0.0004427343  ;;  %vm455_vm14 = vcmp.ne.f32.partialorder %v2429_v37, %v2429_v37 }
 0x166   :  { %v968_v62 = vsel %vm456_vm12, %v2428_v30, %v936_v21  ;;  %vm454_vm15 = vcmp.ne.f32.partialorder %v2430_v26, %v2430_v26  ;;  %v1044_v60 = vlaneseq }
 0x167   :  { %v1329_v54 = vpop.eup %1328  ;;  %1034 = vmatpush.msrb.mxu2 %v968_v62  ;;  %v791_v33 = vsel %vm790_vm11, %v788_v8, %v785_v49 }
 0x168   :  { %v935_v3 = vadd.f32 %v791_v33, %v423_v48  ;;  %v776_v40 = vmul.f32 0.6931472, %v1329_v54  ;;  %v1045_v44 = vshrl.u32 %v1044_v60, 7 }
 0x16a   :  { %v967_v13 = vsel %vm455_vm14, %v2429_v37, %v935_v3  ;;  %v782_v42 = vsel %vm781_vm13, %v779_v1, %v776_v40  ;;  %v1051_v17 = vand.u32 3, %v1045_v44  ;;  %v1046_v4 = vadd.s32 8, %v1045_v44 }
 0x16b   :  { %1035 = vmatpush.msrb.mxu2 %v967_v13  ;;  %v934_v34 = vadd.f32 %v782_v42, %v422_v50 }
 0x16c   :  { %vm1113_vm4 = vcmp.eq.s32.totalorder %v1051_v17, 0  ;;  %v1058_v9 = vand.u32 3, %v1046_v4 }
 0x16d   :  { %v966_v35 = vsel %vm454_vm15, %v2430_v26, %v934_v34 }
 0x16e   :  { %1036 = vmatpush.msrb.mxu2 %v966_v35  ;;  %vm1114_vm9 = vcmp.eq.s32.totalorder %v1058_v9, 0 }
 0x16f   :  { %1037 = vmatmul.f32.vlgmr.msrb.gmra.mxu2 %v983_v58 }
 0x177   :  { %1040 = vmatmul.f32.gmra.mxu2 %v985_v7 }
 0x1c8   :  { %v1015_v18 = vpop.f32.mrf.mxu1 }
 0x1c9   :  { %v1016_v63 = vadd.f32 %v1015_v18, %v991_v6 }
 0x1d0   :  { %v1018_v57 = vpop.f32.mrf.mxu1 }
 0x1d1   :  { %v1019_v53 = vadd.f32 %v1018_v57, %v996_v55 }
 0x1f2   :  { %v1038_v11 = vpop.f32.mrf.mxu2 }
 0x1f3   :  { %v1039_v47 = vadd.f32 %v1038_v11, %v1016_v63 }
 0x1f5   :  { %v1139_v39 = vmul.f32 -1.442695, %v1039_v47 }
 0x1f7   :  { %1330 = vpow2.f32 %v1139_v39 }
 0x1fa   :  { %v1041_v38 = vpop.f32.mrf.mxu2 }
 0x1fb   :  { %v1042_v31 = vadd.f32 %v1041_v38, %v1019_v53 }
 0x1fd   :  { %v1331_v36 = vpop.eup %1330  ;;  %v1140_v41 = vmul.f32 -1.442695, %v1042_v31 }
 0x1fe   :  { %v1077_v61 = vadd.f32 1.0, %v1331_v36 }
 0x1ff   :  { %1332 = vpow2.f32 %v1140_v41 }
 0x200   :  { %1334 = vrcp.f32 %v1077_v61  ;;  %v1090_v10 = vand.u32 2147483648, %v1077_v61  ;;  %v1088_v59 = vand.u32 2147483647, %v1077_v61  ;;  %vm1084_vm1 = vweird.f32 %v1077_v61 }
 0x202   :  { %v1091_v46 = vor.u32 1.1754944e-38, %v1090_v10  ;;  %vm1089_vm3 = vcmp.eq.f32.partialorder %v1088_v59, 8.507059e+37 }
 0x205   :  { %v1333_v27 = vpop.eup %1332 }
 0x206   :  { %v1335_v43 = vpop.eup %1334  ;;  %v1078_v19 = vadd.f32 1.0, %v1333_v27 }
 0x207   :  { %v1080_v12 = vmul.f32 %v1335_v43, %v1077_v61  ;;  %vm1085_vm0 = vweird.f32 %v1335_v43 }
 0x208   :  { %1336 = vrcp.f32 %v1078_v19  ;;  %vm1086_vm2 = vmor %vm1084_vm1, %vm1085_vm0  ;;  %v1105_v15 = vand.u32 2147483648, %v1078_v19  ;;  %v1103_v22 = vand.u32 2147483647, %v1078_v19  ;;  %vm1099_vm6 = vweird.f32 %v1078_v19 }
 0x209   :  { %v1081_v14 = vsub.f32 1.0, %v1080_v12 }
 0x20a   :  { %v1106_v28 = vor.u32 1.1754944e-38, %v1105_v15  ;;  %vm1104_vm8 = vcmp.eq.f32.partialorder %v1103_v22, 8.507059e+37 }
 0x20b   :  { %v1082_v0 = vmul.f32 %v1335_v43, %v1081_v14 }
 0x20d   :  { %v1083_v5 = vadd.f32 %v1335_v43, %v1082_v0 }
 0x20e   :  { %v1337_v23 = vpop.eup %1336 }
 0x20f   :  { %v1087_v24 = vsel %vm1086_vm2, %v1335_v43, %v1083_v5  ;;  %v1095_v25 = vmul.f32 %v1337_v23, %v1078_v19  ;;  %vm1100_vm5 = vweird.f32 %v1337_v23 }
 0x210   :  { %v1092_v20 = vsel %vm1089_vm3, %v1091_v46, %v1087_v24  ;;  %vm1101_vm7 = vmor %vm1099_vm6, %vm1100_vm5 }
 0x211   :  { %v1109_v52 = vmul.f32 1.002, %v1092_v20  ;;  %v1096_v16 = vsub.f32 1.0, %v1095_v25 }
 0x213   :  { %v1141_v45 = vadd.f32 -0.001, %v1109_v52  ;;  %v1097_v2 = vmul.f32 %v1337_v23, %v1096_v16 }
 0x215   :  { %v1115_v30 = vsel %vm1113_vm4, %v1039_v47, %v1141_v45  ;;  %v1098_v29 = vadd.f32 %v1337_v23, %v1097_v2 }
 0x216   :  { %1117 = vst [vmem:[#allocation7] sm:$0xff] %v1115_v30 }
 0x217   :  { %v1102_v56 = vsel %vm1101_vm7, %v1337_v23, %v1098_v29 }
 0x218   :  { %v1107_v8 = vsel %vm1104_vm8, %v1106_v28, %v1102_v56 }
 0x219   :  { %v1110_v32 = vmul.f32 1.002, %v1107_v8 }
 0x21b   :  { %v1142_v51 = vadd.f32 -0.001, %v1110_v32 }
 0x21d   :  { %v1116_v21 = vsel %vm1114_vm9, %v1042_v31, %v1142_v51 }
 0x21e   :  { %1118 = vst [vmem:[#allocation7 + $0x8] sm:$0xff] %v1116_v21 }
 0x21f   :  { %1131 = dma.vmem_to_hbm [thread:$0]  %s1124_s9, 256, %s1126_s12, [#allocation4], %s1417_s26, %s1417_s26, %s1418_s27  }
 0x220   :  { %1414 = dma.done.wait [#allocation4], 256  }
 0x221   :  { %1415 = vsyncadd [#allocation4], 4294967040 }
 0x222   :  { %1136 = vsyncpa [#allocation3], 1 }
 0x223   :  { %1137 = vsyncpa [#allocation6], 1 }
 0x224   :  { %1138 = vsyncpa [#allocation4], 1 }

</bundles_post_ra>
